<compile_context>
chip_gen: v5e
topology: v5e:2x2
jax: 0.10.0
libtpu: 0.0.40
codegen_flags: <defaults>
</compile_context>

<pallas_src>
import functools

import jax
import jax.numpy as jnp
from jax import lax
from jax.experimental import pallas as pl
from jax.experimental.pallas import tpu as pltpu

# MLP layer widths (fixed by the module, except the input dim)
HIDDEN = (512, 256, 128, 64, 32, 1)


def _mlp_kernel(x_ref,
                w1_ref, b1_ref,
                w2_ref, b2_ref,
                w3_ref, b3_ref,
                w4_ref, b4_ref,
                w5_ref, b5_ref,
                w6_ref, b6_ref,
                o_ref, *, n_sub):
    """Fused 6-layer MLP on one batch tile.

    x_ref:   [batch_tile, in_dim] f32 (natural layout, batch on sublanes).
    w1..w5:  bf16 [out, in];  b1..b5: f32 [out, 1].
    w6:      f32 [32, 1] (transposed 32->1 weight);  b6: f32 [1, 1].
    o_ref:   [1, batch_tile] f32 (lane-dense).

    Internally activations are carried transposed ([features, sub_tile],
    batch on lanes) and split into `n_sub` independent lane halves so MXU and
    VPU work of different halves can overlap.
    """
    bt = x_ref.shape[0]
    sub = bt // n_sub

    # ---- Layer 1: contract in_dim of W1 [512,in] and x tile [sub,in] so the
    # result is already transposed ([512, sub]); no transpose op needed.
    dnums = (((1,), (1,)), ((), ()))
    hs = []
    for s in range(n_sub):
        xs = x_ref[pl.ds(s * sub, sub), :].astype(jnp.bfloat16)     # [sub, in]
        y = lax.dot_general(w1_ref[...], xs, dnums,
                            preferred_element_type=jnp.float32)      # [512, sub]
        # f32 bias + ReLU (v5e-safe), bf16 staging for the next MXU layer.
        hs.append(jnp.maximum(y + b1_ref[...], 0.0).astype(jnp.bfloat16))

    def dense(hs, w_ref, b_ref, *, out_bf16):
        ys = [jnp.dot(w_ref[...], h, preferred_element_type=jnp.float32)
              for h in hs]
        acts = [jnp.maximum(y + b_ref[...], 0.0) for y in ys]
        if out_bf16:
            acts = [a.astype(jnp.bfloat16) for a in acts]
        return acts

    hs = dense(hs, w2_ref, b2_ref, out_bf16=True)     # [256, sub] bf16
    hs = dense(hs, w3_ref, b3_ref, out_bf16=True)     # [128, sub] bf16
    hs = dense(hs, w4_ref, b4_ref, out_bf16=True)     # [ 64, sub] bf16
    hs = dense(hs, w5_ref, b5_ref, out_bf16=False)    # [ 32, sub] f32

    # ---- Final 32 -> 1 layer on VPU/XLU: broadcast-multiply + sublane
    # reduction; avoids an M=1 MXU pass and keeps the store lane-dense.
    for s, h in enumerate(hs):
        out = jnp.sum(h * w6_ref[...], axis=0, keepdims=True) + b6_ref[...]
        o_ref[:, pl.ds(s * sub, sub)] = out.astype(o_ref.dtype)


def _choose_batch_tile(batch):
    # Big tiles at large batch to amortize the ~0.35us/grid-step overhead;
    # thresholds keep >= 2 (even) grid steps so both v7x TensorCores get work.
    if batch >= 8192:
        return 2048
    if batch >= 4096:
        return 1024
    if batch >= 1024:
        return 512
    return 128


@functools.partial(jax.jit, static_argnames=("batch_tile",))
def regression_nn_forward(x, kernel_params, *, batch_tile=None):
    """RegressionNN forward via one fused Pallas kernel.

    x:             [B, input_dim] float32 (natural layout, no preprocessing).
    kernel_params: output of prepare_params() (bf16 weights, f32 biases).
    returns        [B, 1] float32
    """
    B, in_dim = x.shape
    if batch_tile is None:
        batch_tile = _choose_batch_tile(B)
    assert batch_tile % 128 == 0, "batch_tile must be a multiple of 128 lanes"

    # Two interleaved sub-tiles whenever each half is still >= 128 lanes.
    n_sub = 2 if batch_tile >= 256 else 1

    grid = pl.cdiv(B, batch_tile)
    bp = grid * batch_tile   # output columns (tail garbage sliced off below)

    # x is tiled along the batch axis directly from HBM (partial final block
    # is fine: garbage rows only affect their own output lanes).  Weights and
    # biases are full blocks with constant index_maps -> resident in VMEM.
    in_specs = [pl.BlockSpec((batch_tile, in_dim), lambda i: (i, 0))]
    for p in kernel_params:
        in_specs.append(pl.BlockSpec(p.shape, lambda i: (0, 0)))

    out = pl.pallas_call(
        functools.partial(_mlp_kernel, n_sub=n_sub),
        out_shape=jax.ShapeDtypeStruct((1, bp), jnp.float32),
        grid_spec=pltpu.PrefetchScalarGridSpec(
            num_scalar_prefetch=0,
            grid=(grid,),
            in_specs=in_specs,
            out_specs=pl.BlockSpec((1, batch_tile), lambda i: (0, i)),
        ),
        compiler_params=pltpu.CompilerParams(
            dimension_semantics=("parallel",),
            vmem_limit_bytes=32 * 1024 * 1024,
        ),
    )(x, *kernel_params)

    return out[0, :B].reshape(B, 1)


def init_params(key, input_dim):
    """PyTorch-layout f32 params: list of (W [out, in], b [out]) per Linear."""
    params = []
    dims = (input_dim,) + HIDDEN
    for li, (d_in, d_out) in enumerate(zip(dims[:-1], dims[1:])):
        kw, kb = jax.random.split(jax.random.fold_in(key, li))
        bound = 1.0 / (d_in ** 0.5)        # torch.nn.Linear default init scale
        w = jax.random.uniform(kw, (d_out, d_in), jnp.float32, -bound, bound)
        b = jax.random.uniform(kb, (d_out,), jnp.float32, -bound, bound)
        params.append((w, b))
    return params


def prepare_params(params):
    """Convert PyTorch-layout f32 params to the kernel's layout / dtypes."""
    flat = []
    n = len(params)
    for i, (w, b) in enumerate(params):
        if i < n - 1:
            flat.append(w.astype(jnp.bfloat16))                 # [out, in] bf16
            flat.append(b.reshape(-1, 1).astype(jnp.float32))   # [out, 1] f32
        else:
            # Last layer (32 -> 1) stays f32 and is consumed on the VPU.
            flat.append(w.reshape(-1, 1).astype(jnp.float32))   # [32, 1]  f32
            flat.append(b.reshape(1, 1).astype(jnp.float32))    # [1, 1]   f32
    return flat


def reference_forward(x, params):
    """Plain-JAX reference emulating the kernel's dtype path (bf16 MXU inputs,
    f32 accumulation, f32 bias/ReLU, f32 final layer)."""
    h = x
    n = len(params)
    for i, (w, b) in enumerate(params):
        if i < n - 1:
            h = jnp.dot(h.astype(jnp.bfloat16), w.T.astype(jnp.bfloat16),
                        preferred_element_type=jnp.float32) + b[None, :]
            h = jnp.maximum(h, 0.0)
        else:
            h = jnp.sum(h * w, axis=-1, keepdims=True) + b[None, :]
    return h


if __name__ == "__main__":
    key = jax.random.PRNGKey(0)
    kx, kp = jax.random.split(key)

    input_dim = 32   # small tabular-regression style input
    torch_params = init_params(kp, input_dim)
    kernel_params = prepare_params(torch_params)

    # Small batch: single 128-lane tile with a partial block (tail lanes are
    # garbage inside the kernel and sliced off in the wrapper).
    x_small = jax.random.normal(kx, (8, input_dim), dtype=jnp.float32)
    out_small = jax.block_until_ready(regression_nn_forward(x_small, kernel_params))
    ref_small = reference_forward(x_small, torch_params)
    assert out_small.shape == (8, 1), out_small.shape
    assert jnp.allclose(out_small, ref_small, atol=2e-3, rtol=2e-3), (
        f"max abs err {jnp.max(jnp.abs(out_small - ref_small))}")

    # Larger batch: 2 grid steps (pipelining / v7x megacore) with the 2-way
    # sub-tile interleave inside each body (batch_tile=256 -> two 128 halves).
    x_big = jax.random.normal(jax.random.fold_in(kx, 1), (512, input_dim),
                              dtype=jnp.float32)
    out_big = jax.block_until_ready(
        regression_nn_forward(x_big, kernel_params, batch_tile=256))
    ref_big = reference_forward(x_big, torch_params)
    assert out_big.shape == (512, 1), out_big.shape
    assert jnp.allclose(out_big, ref_big, atol=2e-3, rtol=2e-3), (
        f"max abs err {jnp.max(jnp.abs(out_big - ref_big))}")

    print("KERNEL_OK")
</pallas_src>

<mosaic_0001>
module attributes {stable_mosaic.version = 11 : i64} {
  func.func @_mlp_kernel(%arg0: i32, %arg1: memref<128x32xf32, #tpu.memory_space<vmem>>, %arg2: memref<512x32xbf16, #tpu.memory_space<vmem>>, %arg3: memref<512x1xf32, #tpu.memory_space<vmem>>, %arg4: memref<256x512xbf16, #tpu.memory_space<vmem>>, %arg5: memref<256x1xf32, #tpu.memory_space<vmem>>, %arg6: memref<128x256xbf16, #tpu.memory_space<vmem>>, %arg7: memref<128x1xf32, #tpu.memory_space<vmem>>, %arg8: memref<64x128xbf16, #tpu.memory_space<vmem>>, %arg9: memref<64x1xf32, #tpu.memory_space<vmem>>, %arg10: memref<32x64xbf16, #tpu.memory_space<vmem>>, %arg11: memref<32x1xf32, #tpu.memory_space<vmem>>, %arg12: memref<32x1xf32, #tpu.memory_space<vmem>>, %arg13: memref<1x1xf32, #tpu.memory_space<vmem>>, %arg14: memref<1x128xf32, #tpu.memory_space<vmem>>) attributes {dimension_semantics = [#tpu.dimension_semantics<parallel>], iteration_bounds = array<i64: 1>, scalar_prefetch = 0 : i64, scratch_operands = 0 : i64, tpu.core_type = #tpu.core_type<tc>, window_params = [{transform_indices = @transform_0, window_bounds = array<i64: 128, 32>}, {pipeline_mode = #tpu.pipeline_mode<synchronous>, transform_indices = @transform_1, window_bounds = array<i64: 512, 32>}, {pipeline_mode = #tpu.pipeline_mode<synchronous>, transform_indices = @transform_2, window_bounds = array<i64: 512, 1>}, {pipeline_mode = #tpu.pipeline_mode<synchronous>, transform_indices = @transform_3, window_bounds = array<i64: 256, 512>}, {pipeline_mode = #tpu.pipeline_mode<synchronous>, transform_indices = @transform_4, window_bounds = array<i64: 256, 1>}, {pipeline_mode = #tpu.pipeline_mode<synchronous>, transform_indices = @transform_5, window_bounds = array<i64: 128, 256>}, {pipeline_mode = #tpu.pipeline_mode<synchronous>, transform_indices = @transform_6, window_bounds = array<i64: 128, 1>}, {pipeline_mode = #tpu.pipeline_mode<synchronous>, transform_indices = @transform_7, window_bounds = array<i64: 64, 128>}, {pipeline_mode = #tpu.pipeline_mode<synchronous>, transform_indices = @transform_8, window_bounds = array<i64: 64, 1>}, {pipeline_mode = #tpu.pipeline_mode<synchronous>, transform_indices = @transform_9, window_bounds = array<i64: 32, 64>}, {pipeline_mode = #tpu.pipeline_mode<synchronous>, transform_indices = @transform_10, window_bounds = array<i64: 32, 1>}, {pipeline_mode = #tpu.pipeline_mode<synchronous>, transform_indices = @transform_11, window_bounds = array<i64: 32, 1>}, {pipeline_mode = #tpu.pipeline_mode<synchronous>, transform_indices = @transform_12, window_bounds = array<i64: 1, 1>}, {transform_indices = @transform_13, window_bounds = array<i64: 1, 128>}]} {
    %c0 = arith.constant 0 : index
    %c0_0 = arith.constant 0 : index
    %0 = vector.load %arg1[%c0, %c0_0] : memref<128x32xf32, #tpu.memory_space<vmem>>, vector<128x32xf32>
    %1 = arith.truncf %0 : vector<128x32xf32> to vector<128x32xbf16>
    %c0_1 = arith.constant 0 : index
    %c0_2 = arith.constant 0 : index
    %2 = vector.load %arg2[%c0_1, %c0_2] : memref<512x32xbf16, #tpu.memory_space<vmem>>, vector<512x32xbf16>
    %cst = arith.constant dense<0.000000e+00> : vector<512x128xf32>
    %3 = tpu.matmul %2, %1, %cst {dimension_numbers = #tpu.dot_dimension_numbers<[1], [1], [0], [0], [0, 0, 1, 0], [], []>} : vector<512x32xbf16>, vector<128x32xbf16>, vector<512x128xf32> -> vector<512x128xf32>
    %c0_3 = arith.constant 0 : index
    %c0_4 = arith.constant 0 : index
    %4 = vector.load %arg3[%c0_3, %c0_4] : memref<512x1xf32, #tpu.memory_space<vmem>>, vector<512x1xf32>
    %5 = vector.broadcast %4 : vector<512x1xf32> to vector<512x128xf32>
    %6 = arith.addf %3, %5 : vector<512x128xf32>
    %cst_5 = arith.constant 0.000000e+00 : f32
    %7 = vector.broadcast %cst_5 : f32 to vector<512x128xf32>
    %8 = arith.maximumf %6, %7 : vector<512x128xf32>
    %9 = arith.truncf %8 : vector<512x128xf32> to vector<512x128xbf16>
    %c0_6 = arith.constant 0 : index
    %c0_7 = arith.constant 0 : index
    %10 = vector.load %arg4[%c0_6, %c0_7] : memref<256x512xbf16, #tpu.memory_space<vmem>>, vector<256x512xbf16>
    %cst_8 = arith.constant dense<0.000000e+00> : vector<256x128xf32>
    %11 = tpu.matmul %10, %9, %cst_8 {dimension_numbers = #tpu.dot_dimension_numbers<[1], [0], [0], [1], [0, 0, 1, 1], [], []>} : vector<256x512xbf16>, vector<512x128xbf16>, vector<256x128xf32> -> vector<256x128xf32>
    %c0_9 = arith.constant 0 : index
    %c0_10 = arith.constant 0 : index
    %12 = vector.load %arg5[%c0_9, %c0_10] : memref<256x1xf32, #tpu.memory_space<vmem>>, vector<256x1xf32>
    %13 = vector.broadcast %12 : vector<256x1xf32> to vector<256x128xf32>
    %14 = arith.addf %11, %13 : vector<256x128xf32>
    %cst_11 = arith.constant 0.000000e+00 : f32
    %15 = vector.broadcast %cst_11 : f32 to vector<256x128xf32>
    %16 = arith.maximumf %14, %15 : vector<256x128xf32>
    %17 = arith.truncf %16 : vector<256x128xf32> to vector<256x128xbf16>
    %c0_12 = arith.constant 0 : index
    %c0_13 = arith.constant 0 : index
    %18 = vector.load %arg6[%c0_12, %c0_13] : memref<128x256xbf16, #tpu.memory_space<vmem>>, vector<128x256xbf16>
    %cst_14 = arith.constant dense<0.000000e+00> : vector<128x128xf32>
    %19 = tpu.matmul %18, %17, %cst_14 {dimension_numbers = #tpu.dot_dimension_numbers<[1], [0], [0], [1], [0, 0, 1, 1], [], []>} : vector<128x256xbf16>, vector<256x128xbf16>, vector<128x128xf32> -> vector<128x128xf32>
    %c0_15 = arith.constant 0 : index
    %c0_16 = arith.constant 0 : index
    %20 = vector.load %arg7[%c0_15, %c0_16] : memref<128x1xf32, #tpu.memory_space<vmem>>, vector<128x1xf32>
    %21 = vector.broadcast %20 : vector<128x1xf32> to vector<128x128xf32>
    %22 = arith.addf %19, %21 : vector<128x128xf32>
    %cst_17 = arith.constant 0.000000e+00 : f32
    %23 = vector.broadcast %cst_17 : f32 to vector<128x128xf32>
    %24 = arith.maximumf %22, %23 : vector<128x128xf32>
    %25 = arith.truncf %24 : vector<128x128xf32> to vector<128x128xbf16>
    %c0_18 = arith.constant 0 : index
    %c0_19 = arith.constant 0 : index
    %26 = vector.load %arg8[%c0_18, %c0_19] : memref<64x128xbf16, #tpu.memory_space<vmem>>, vector<64x128xbf16>
    %cst_20 = arith.constant dense<0.000000e+00> : vector<64x128xf32>
    %27 = tpu.matmul %26, %25, %cst_20 {dimension_numbers = #tpu.dot_dimension_numbers<[1], [0], [0], [1], [0, 0, 1, 1], [], []>} : vector<64x128xbf16>, vector<128x128xbf16>, vector<64x128xf32> -> vector<64x128xf32>
    %c0_21 = arith.constant 0 : index
    %c0_22 = arith.constant 0 : index
    %28 = vector.load %arg9[%c0_21, %c0_22] : memref<64x1xf32, #tpu.memory_space<vmem>>, vector<64x1xf32>
    %29 = vector.broadcast %28 : vector<64x1xf32> to vector<64x128xf32>
    %30 = arith.addf %27, %29 : vector<64x128xf32>
    %cst_23 = arith.constant 0.000000e+00 : f32
    %31 = vector.broadcast %cst_23 : f32 to vector<64x128xf32>
    %32 = arith.maximumf %30, %31 : vector<64x128xf32>
    %33 = arith.truncf %32 : vector<64x128xf32> to vector<64x128xbf16>
    %c0_24 = arith.constant 0 : index
    %c0_25 = arith.constant 0 : index
    %34 = vector.load %arg10[%c0_24, %c0_25] : memref<32x64xbf16, #tpu.memory_space<vmem>>, vector<32x64xbf16>
    %cst_26 = arith.constant dense<0.000000e+00> : vector<32x128xf32>
    %35 = tpu.matmul %34, %33, %cst_26 {dimension_numbers = #tpu.dot_dimension_numbers<[1], [0], [0], [1], [0, 0, 1, 1], [], []>} : vector<32x64xbf16>, vector<64x128xbf16>, vector<32x128xf32> -> vector<32x128xf32>
    %c0_27 = arith.constant 0 : index
    %c0_28 = arith.constant 0 : index
    %36 = vector.load %arg11[%c0_27, %c0_28] : memref<32x1xf32, #tpu.memory_space<vmem>>, vector<32x1xf32>
    %37 = vector.broadcast %36 : vector<32x1xf32> to vector<32x128xf32>
    %38 = arith.addf %35, %37 : vector<32x128xf32>
    %cst_29 = arith.constant 0.000000e+00 : f32
    %39 = vector.broadcast %cst_29 : f32 to vector<32x128xf32>
    %40 = arith.maximumf %38, %39 : vector<32x128xf32>
    %c0_30 = arith.constant 0 : index
    %c0_31 = arith.constant 0 : index
    %41 = vector.load %arg12[%c0_30, %c0_31] : memref<32x1xf32, #tpu.memory_space<vmem>>, vector<32x1xf32>
    %42 = vector.broadcast %41 : vector<32x1xf32> to vector<32x128xf32>
    %43 = arith.mulf %40, %42 : vector<32x128xf32>
    %cst_32 = arith.constant dense<0.000000e+00> : vector<128xf32>
    %44 = vector.multi_reduction <add>, %43, %cst_32 [0] : vector<32x128xf32> to vector<128xf32>
    %45 = vector.shape_cast %44 : vector<128xf32> to vector<1x128xf32>
    %c0_33 = arith.constant 0 : index
    %c0_34 = arith.constant 0 : index
    %46 = vector.load %arg13[%c0_33, %c0_34] : memref<1x1xf32, #tpu.memory_space<vmem>>, vector<1x1xf32>
    %47 = vector.broadcast %46 : vector<1x1xf32> to vector<1x128xf32>
    %48 = arith.addf %45, %47 : vector<1x128xf32>
    %c0_35 = arith.constant 0 : index
    %c0_36 = arith.constant 0 : index
    %49 = vector.load %arg14[%c0_35, %c0_36] : memref<1x128xf32, #tpu.memory_space<vmem>>, vector<1x128xf32>
    tpu.vector_store %arg14[%c0_35, %c0_36], %48 {strides = array<i32>} : memref<1x128xf32, #tpu.memory_space<vmem>>, vector<1x128xf32>,
    return
  }
  func.func @transform_0(%arg0: i32) -> (i32, i32) {
    %c0_i32 = arith.constant 0 : i32
    %c0_i32_0 = arith.constant 0 : i32
    return %arg0, %c0_i32 : i32, i32
  }
  func.func @transform_1(%arg0: i32) -> (i32, i32) {
    %c0_i32 = arith.constant 0 : i32
    %c0_i32_0 = arith.constant 0 : i32
    %c0_i32_1 = arith.constant 0 : i32
    return %c0_i32, %c0_i32_0 : i32, i32
  }
  func.func @transform_2(%arg0: i32) -> (i32, i32) {
    %c0_i32 = arith.constant 0 : i32
    %c0_i32_0 = arith.constant 0 : i32
    %c0_i32_1 = arith.constant 0 : i32
    return %c0_i32, %c0_i32_0 : i32, i32
  }
  func.func @transform_3(%arg0: i32) -> (i32, i32) {
    %c0_i32 = arith.constant 0 : i32
    %c0_i32_0 = arith.constant 0 : i32
    %c0_i32_1 = arith.constant 0 : i32
    return %c0_i32, %c0_i32_0 : i32, i32
  }
  func.func @transform_4(%arg0: i32) -> (i32, i32) {
    %c0_i32 = arith.constant 0 : i32
    %c0_i32_0 = arith.constant 0 : i32
    %c0_i32_1 = arith.constant 0 : i32
    return %c0_i32, %c0_i32_0 : i32, i32
  }
  func.func @transform_5(%arg0: i32) -> (i32, i32) {
    %c0_i32 = arith.constant 0 : i32
    %c0_i32_0 = arith.constant 0 : i32
    %c0_i32_1 = arith.constant 0 : i32
    return %c0_i32, %c0_i32_0 : i32, i32
  }
  func.func @transform_6(%arg0: i32) -> (i32, i32) {
    %c0_i32 = arith.constant 0 : i32
    %c0_i32_0 = arith.constant 0 : i32
    %c0_i32_1 = arith.constant 0 : i32
    return %c0_i32, %c0_i32_0 : i32, i32
  }
  func.func @transform_7(%arg0: i32) -> (i32, i32) {
    %c0_i32 = arith.constant 0 : i32
    %c0_i32_0 = arith.constant 0 : i32
    %c0_i32_1 = arith.constant 0 : i32
    return %c0_i32, %c0_i32_0 : i32, i32
  }
  func.func @transform_8(%arg0: i32) -> (i32, i32) {
    %c0_i32 = arith.constant 0 : i32
    %c0_i32_0 = arith.constant 0 : i32
    %c0_i32_1 = arith.constant 0 : i32
    return %c0_i32, %c0_i32_0 : i32, i32
  }
  func.func @transform_9(%arg0: i32) -> (i32, i32) {
    %c0_i32 = arith.constant 0 : i32
    %c0_i32_0 = arith.constant 0 : i32
    %c0_i32_1 = arith.constant 0 : i32
    return %c0_i32, %c0_i32_0 : i32, i32
  }
  func.func @transform_10(%arg0: i32) -> (i32, i32) {
    %c0_i32 = arith.constant 0 : i32
    %c0_i32_0 = arith.constant 0 : i32
    %c0_i32_1 = arith.constant 0 : i32
    return %c0_i32, %c0_i32_0 : i32, i32
  }
  func.func @transform_11(%arg0: i32) -> (i32, i32) {
    %c0_i32 = arith.constant 0 : i32
    %c0_i32_0 = arith.constant 0 : i32
    %c0_i32_1 = arith.constant 0 : i32
    return %c0_i32, %c0_i32_0 : i32, i32
  }
  func.func @transform_12(%arg0: i32) -> (i32, i32) {
    %c0_i32 = arith.constant 0 : i32
    %c0_i32_0 = arith.constant 0 : i32
    %c0_i32_1 = arith.constant 0 : i32
    return %c0_i32, %c0_i32_0 : i32, i32
  }
  func.func @transform_13(%arg0: i32) -> (i32, i32) {
    %c0_i32 = arith.constant 0 : i32
    %c0_i32_0 = arith.constant 0 : i32
    return %c0_i32, %arg0 : i32, i32
  }
}

</mosaic_0001>

<bundles_post_ra>
// kernel: regression_nn_forward.1
= control target key start
LH: loop header
LB: loop body
LE: loop exit
PB: predicated region body
PF: predicated region fallthrough
CT: control target
= control target key end

     0   :  { %v3234_v0 = vmov 0   ;;  %vm679_vm0 = vcmask 261120   ;;  %vm2518_vm1 = vcmask 523264   ;;  %s4992_s2 = inlined_call_operand.vmem [shape: f32[512,1], index: 2, kind: input, shape index: {}]   ;;  %s4993_s0 = inlined_call_operand.vmem [shape: f32[8,32], index: 0, kind: input, shape index: {}]   ;;  %s4994_s1 = inlined_call_operand.vmem [shape: bf16[512,32], index: 1, kind: input, shape index: {}]   ;;  %s4995_s4 = inlined_call_operand.vmem [shape: f32[256,1], index: 4, kind: input, shape index: {}]   ;;  %s4996_s6 = inlined_call_operand.vmem [shape: f32[128,1], index: 6, kind: input, shape index: {}]   ;;  %s4997_s8 = inlined_call_operand.vmem [shape: f32[64,1], index: 8, kind: input, shape index: {}]   ;;  %s4998_s12 = inlined_call_operand.<no memory space> [shape: f32[1,1], index: 12, kind: input, shape index: {}]   ;;  %s4999_s10 = inlined_call_operand.vmem [shape: f32[32,1], index: 10, kind: input, shape index: {}]   ;;  %s5000_s11 = inlined_call_operand.vmem [shape: f32[32,1], index: 11, kind: input, shape index: {}]   ;;  %s5001_s3 = inlined_call_operand.vmem [shape: bf16[256,512], index: 3, kind: input, shape index: {}]   ;;  %s5002_s5 = inlined_call_operand.vmem [shape: bf16[128,256], index: 5, kind: input, shape index: {}]   ;;  %s5003_s7 = inlined_call_operand.vmem [shape: bf16[64,128], index: 7, kind: input, shape index: {}]   ;;  %s5004_s9 = inlined_call_operand.vmem [shape: bf16[32,64], index: 9, kind: input, shape index: {}]   ;;  %s5005_s13 = inlined_call_operand.vmem [shape: f32[1,128], index: 13, kind: output, shape index: {}]  }
   0x1   :  { %3233 = vset.pattern.permute.xlu2 %v3234_v0  ;;  %3232 = vset.pattern.permute.xlu1 %v3234_v0  ;;  %v149_v1 = vld [vmem:[%s4992_s2 + $0x70] sm:$0xff]  ;;  %v147_v2 = vld [vmem:[%s4992_s2 + $0x60] sm:$0xff]  ;;  %v62_v5 = vld [vmem:[%s4993_s0 + $0x78] sm:$0xff] }
   0x2   :  { %v145_v3 = vld [vmem:[%s4992_s2 + $0x50] sm:$0xff]  ;;  %3231 = vset.pattern.permute.xlu0 %v3234_v0  ;;  %261 = vperm.xlu1 %3232, %v147_v2   ;;  %v59_v7 = vld [vmem:[%s4993_s0 + $0x60] sm:$0xff]  ;;  %v60_v8 = vld [vmem:[%s4993_s0 + $0x68] sm:$0xff] }
   0x3   :  { %v61_v4 = vld [vmem:[%s4993_s0 + $0x70] sm:$0xff]  ;;  %271 = vperm.xlu0 %3231, %v149_v1   ;;  %251 = vperm.xlu2 %3233, %v145_v3   ;;  %v148_v10 = vld [vmem:[%s4992_s2 + $0x68] sm:$0xff]  ;;  %v69_v11 = vpack.c.bf16 %v60_v8, %v59_v7  ;;  %v150_v12 = vld [vmem:[%s4992_s2 + $0x78] sm:$0xff] }
   0x4   :  { %v70_v6 = vpack.c.bf16 %v62_v5, %v61_v4  ;;  %v146_v13 = vld [vmem:[%s4992_s2 + $0x58] sm:$0xff]  ;;  %v57_v15 = vld [vmem:[%s4993_s0 + $0x50] sm:$0xff]  ;;  %v144_v17 = vld [vmem:[%s4992_s2 + $0x48] sm:$0xff] }
   0x5   :  { %v795_v14 = vsel %vm679_vm0, %v69_v11, 0  ;;  %v58_v16 = vld [vmem:[%s4993_s0 + $0x58] sm:$0xff]  ;;  %v143_v19 = vld [vmem:[%s4992_s2 + $0x40] sm:$0xff]  ;;  %v141_v20 = vld [vmem:[%s4992_s2 + $0x30] sm:$0xff] }
   0x6   :  { %v798_v9 = vsel %vm679_vm0, %v70_v6, 0  ;;  %v68_v18 = vpack.c.bf16 %v58_v16, %v57_v15  ;;  %v55_v22 = vld [vmem:[%s4993_s0 + $0x40] sm:$0xff]  ;;  %v56_v23 = vld [vmem:[%s4993_s0 + $0x48] sm:$0xff]  ;;  %v142_v26 = vld [vmem:[%s4992_s2 + $0x38] sm:$0xff] }
   0x7   :  { %800 = vmatpush.bf16.xpose.msra.mxu0 %v798_v9  ;;  %3222 = vmatpush.bf16.xpose.msra.mxu3 %v798_v9  ;;  %v139_v24 = vld [vmem:[%s4992_s2 + $0x20] sm:$0xff]  ;;  %v67_v25 = vpack.c.bf16 %v56_v23, %v55_v22  ;;  %v140_v27 = vld [vmem:[%s4992_s2 + $0x28] sm:$0xff]  ;;  %v53_v29 = vld [vmem:[%s4993_s0 + $0x30] sm:$0xff] }
   0x8   :  { %v792_v21 = vsel %vm679_vm0, %v68_v18, 0  ;;  %v54_v30 = vld [vmem:[%s4993_s0 + $0x38] sm:$0xff]  ;;  %v137_v33 = vld [vmem:[%s4992_s2 + $0x10] sm:$0xff]  ;;  %v135_v34 = vld [vmem:[%s4992_s2] sm:$0xff] }
   0x9   :  { %v789_v28 = vsel %vm679_vm0, %v67_v25, 0  ;;  %v138_v31 = vld [vmem:[%s4992_s2 + $0x18] sm:$0xff]  ;;  %v66_v32 = vpack.c.bf16 %v54_v30, %v53_v29  ;;  %v51_v36 = vld [vmem:[%s4993_s0 + $0x20] sm:$0xff]  ;;  %v52_v37 = vld [vmem:[%s4993_s0 + $0x28] sm:$0xff] }
   0xa   :  { %266 = vperm.xlu1 %3232, %v148_v10   ;;  %v165_v38 = vld [vmem:[%s4992_s2 + $0xf0] sm:$0xff]  ;;  %v65_v39 = vpack.c.bf16 %v52_v37, %v51_v36  ;;  %v136_v40 = vld [vmem:[%s4992_s2 + $0x8] sm:$0xff]  ;;  %v166_v41 = vld [vmem:[%s4992_s2 + $0xf8] sm:$0xff] }
   0xb   :  { %276 = vperm.xlu0 %3231, %v150_v12   ;;  %256 = vperm.xlu2 %3233, %v146_v13   ;;  %v786_v35 = vsel %vm679_vm0, %v66_v32, 0  ;;  %v49_v43 = vld [vmem:[%s4993_s0 + $0x10] sm:$0xff]  ;;  %v50_v44 = vld [vmem:[%s4993_s0 + $0x18] sm:$0xff]  ;;  %v163_v48 = vld [vmem:[%s4992_s2 + $0xe0] sm:$0xff] }
   0xc   :  { %v783_v42 = vsel %vm679_vm0, %v65_v39, 0  ;;  %v182_v45 = vld [vmem:[%s4992_s2 + $0x178] sm:$0xff]  ;;  %v64_v46 = vpack.c.bf16 %v50_v44, %v49_v43  ;;  %v181_v47 = vld [vmem:[%s4992_s2 + $0x170] sm:$0xff]  ;;  %v47_v50 = vld [vmem:[%s4993_s0] sm:$0xff] }
   0xd   :  { %v48_v51 = vld [vmem:[%s4993_s0 + $0x8] sm:$0xff]  ;;  %v179_v52 = vld [vmem:[%s4992_s2 + $0x160] sm:$0xff]  ;;  %v162_v57 = vld [vmem:[%s4992_s2 + $0xd8] sm:$0xff] }
   0xe   :  { %v780_v49 = vsel %vm679_vm0, %v64_v46, 0  ;;  %v63_v53 = vpack.c.bf16 %v48_v51, %v47_v50  ;;  %v164_v54 = vld [vmem:[%s4992_s2 + $0xe8] sm:$0xff]  ;;  %v161_v58 = vld [vmem:[%s4992_s2 + $0xd0] sm:$0xff]  ;;  %v3104_v60 = vld [vmem:[%s4994_s1] sm:$0xff] }
   0xf   :  { %801 = vmatpush.bf16.xpose.msra.mxu0 %v795_v14  ;;  %3223 = vmatpush.bf16.xpose.msra.mxu3 %v795_v14  ;;  %v180_v55 = vld [vmem:[%s4992_s2 + $0x168] sm:$0xff]  ;;  %v177_v59 = vld [vmem:[%s4992_s2 + $0x150] sm:$0xff]  ;;  %v178_v62 = vld [vmem:[%s4992_s2 + $0x158] sm:$0xff] }
  0x10   :  { %v777_v56 = vsel %vm679_vm0, %v63_v53, 0  ;;  %v197_v61 = vld [vmem:[%s4992_s2 + $0x1f0] sm:$0xff]  ;;  %v198_v63 = vld [vmem:[%s4992_s2 + $0x1f8] sm:$0xff]  ;;  %v160_v0 = vld [vmem:[%s4992_s2 + $0xc8] sm:$0xff] }
  0x11   :  { %v159_v1 = vld [vmem:[%s4992_s2 + $0xc0] sm:$0xff]  ;;  %v3105_v3 = vld [vmem:[%s4994_s1 + $0x8] sm:$0xff]  ;;  %v158_v7 = vld [vmem:[%s4992_s2 + $0xb8] sm:$0xff] }
  0x12   :  { %246 = vperm.xlu1 %3232, %v144_v17   ;;  %v175_v2 = vld [vmem:[%s4992_s2 + $0x140] sm:$0xff]  ;;  %v176_v5 = vld [vmem:[%s4992_s2 + $0x148] sm:$0xff]  ;;  %v157_v8 = vld [vmem:[%s4992_s2 + $0xb0] sm:$0xff] }
  0x13   :  { %241 = vperm.xlu0 %3231, %v143_v19   ;;  %231 = vperm.xlu2 %3233, %v141_v20   ;;  %v195_v4 = vld [vmem:[%s4992_s2 + $0x1e0] sm:$0xff]  ;;  %v196_v6 = vld [vmem:[%s4992_s2 + $0x1e8] sm:$0xff]  ;;  %v173_v9 = vld [vmem:[%s4992_s2 + $0x130] sm:$0xff] }
  0x14   :  { %v3106_v10 = vld [vmem:[%s4994_s1 + $0x10] sm:$0xff]  ;;  %v174_v12 = vld [vmem:[%s4992_s2 + $0x138] sm:$0xff]  ;;  %v156_v14 = vld [vmem:[%s4992_s2 + $0xa8] sm:$0xff] }
  0x15   :  { %v193_v11 = vld [vmem:[%s4992_s2 + $0x1d0] sm:$0xff]  ;;  %v194_v13 = vld [vmem:[%s4992_s2 + $0x1d8] sm:$0xff]  ;;  %v155_v15 = vld [vmem:[%s4992_s2 + $0xa0] sm:$0xff] }
  0x16   :  { %v171_v16 = vld [vmem:[%s4992_s2 + $0x120] sm:$0xff]  ;;  %v3107_v17 = vld [vmem:[%s4994_s1 + $0x18] sm:$0xff]  ;;  %v172_v19 = vld [vmem:[%s4992_s2 + $0x128] sm:$0xff] }
  0x17   :  { %802 = vmatpush.bf16.xpose.msra.mxu0 %v792_v21  ;;  %3224 = vmatpush.bf16.xpose.msra.mxu3 %v792_v21  ;;  %v191_v18 = vld [vmem:[%s4992_s2 + $0x1c0] sm:$0xff]  ;;  %v192_v20 = vld [vmem:[%s4992_s2 + $0x1c8] sm:$0xff]  ;;  %v154_v21 = vld [vmem:[%s4992_s2 + $0x98] sm:$0xff] }
  0x18   :  { %v153_v22 = vld [vmem:[%s4992_s2 + $0x90] sm:$0xff]  ;;  %v151_v29 = vld [vmem:[%s4992_s2 + $0x80] sm:$0xff]  ;;  %v188_v36 = vld [vmem:[%s4992_s2 + $0x1a8] sm:$0xff] }
  0x19   :  { %v169_v23 = vld [vmem:[%s4992_s2 + $0x110] sm:$0xff]  ;;  %v167_v30 = vld [vmem:[%s4992_s2 + $0x100] sm:$0xff]  ;;  %v3133_v44 = vld [vmem:[%s4994_s1 + $0xe8] sm:$0xff] }
  0x1a   :  { %221 = vperm.xlu1 %3232, %v139_v24   ;;  %v3108_v24 = vld [vmem:[%s4994_s1 + $0x20] sm:$0xff]  ;;  %v189_v25 = vld [vmem:[%s4992_s2 + $0x1b0] sm:$0xff]  ;;  %v1160_v51 = vld [vmem:[%s4995_s4 + $0xf8] sm:$0xff] }
  0x1b   :  { %236 = vperm.xlu0 %3231, %v142_v26   ;;  %226 = vperm.xlu2 %3233, %v140_v27   ;;  %v170_v26 = vld [vmem:[%s4992_s2 + $0x118] sm:$0xff]  ;;  %v3110_v43 = vld [vmem:[%s4994_s1 + $0x30] sm:$0xff]  ;;  %v1141_v53 = vld [vmem:[%s4995_s4 + $0x60] sm:$0xff] }
  0x1c   :  { %v190_v27 = vld [vmem:[%s4992_s2 + $0x1b8] sm:$0xff] }
  0x1f   :  { %803 = vmatpush.bf16.xpose.msra.mxu0 %v789_v28  ;;  %3225 = vmatpush.bf16.xpose.msra.mxu3 %v789_v28  ;;  %v152_v28 = vld [vmem:[%s4992_s2 + $0x88] sm:$0xff] }
  0x22   :  { %216 = vperm.xlu1 %3232, %v138_v31   ;;  %v3109_v31 = vld [vmem:[%s4994_s1 + $0x28] sm:$0xff] }
  0x23   :  { %211 = vperm.xlu0 %3231, %v137_v33   ;;  %201 = vperm.xlu2 %3233, %v135_v34   ;;  %v187_v34 = vld [vmem:[%s4992_s2 + $0x1a0] sm:$0xff] }
  0x27   :  { %804 = vmatpush.bf16.xpose.msra.mxu0 %v786_v35  ;;  %3226 = vmatpush.bf16.xpose.msra.mxu3 %v786_v35  ;;  %v168_v35 = vld [vmem:[%s4992_s2 + $0x108] sm:$0xff] }
  0x2a   :  { %351 = vperm.xlu1 %3232, %v165_v38   ;;  %v186_v38 = vld [vmem:[%s4992_s2 + $0x198] sm:$0xff] }
  0x2b   :  { %206 = vperm.xlu0 %3231, %v136_v40   ;;  %356 = vperm.xlu2 %3233, %v166_v41   ;;  %v185_v41 = vld [vmem:[%s4992_s2 + $0x190] sm:$0xff] }
  0x2f   :  { %805 = vmatpush.bf16.xpose.msra.mxu0 %v783_v42  ;;  %3227 = vmatpush.bf16.xpose.msra.mxu3 %v783_v42  ;;  %v183_v42 = vld [vmem:[%s4992_s2 + $0x180] sm:$0xff] }
  0x32   :  { %436 = vperm.xlu1 %3232, %v182_v45   ;;  %v1143_v45 = vld [vmem:[%s4995_s4 + $0x70] sm:$0xff] }
  0x33   :  { %431 = vperm.xlu0 %3231, %v181_v47   ;;  %341 = vperm.xlu2 %3233, %v163_v48   ;;  %v184_v47 = vld [vmem:[%s4992_s2 + $0x188] sm:$0xff]  ;;  %v1144_v48 = vld [vmem:[%s4995_s4 + $0x78] sm:$0xff] }
  0x37   :  { %806 = vmatpush.bf16.xpose.msra.mxu0 %v780_v49  ;;  %3228 = vmatpush.bf16.xpose.msra.mxu3 %v780_v49 }
  0x3a   :  { %421 = vperm.xlu1 %3232, %v179_v52   ;;  %v1159_v52 = vld [vmem:[%s4995_s4 + $0xf0] sm:$0xff] }
  0x3b   :  { %346 = vperm.xlu0 %3231, %v164_v54   ;;  %426 = vperm.xlu2 %3233, %v180_v55   ;;  %v3111_v54 = vld [vmem:[%s4994_s1 + $0x38] sm:$0xff]  ;;  %v3134_v55 = vld [vmem:[%s4994_s1 + $0xf0] sm:$0xff] }
  0x3f   :  { %807 = vmatpush.bf16.xpose.msra.mxu0 %v777_v56  ;;  %3229 = vmatpush.bf16.xpose.msra.mxu3 %v777_v56 }
  0x42   :  { %336 = vperm.xlu1 %3232, %v162_v57  }
  0x43   :  { %331 = vperm.xlu0 %3231, %v161_v58   ;;  %411 = vperm.xlu2 %3233, %v177_v59   ;;  %v1157_v59 = vld [vmem:[%s4995_s4 + $0xe0] sm:$0xff] }
  0x46   :  { %2726 = vmatmul.msk.bf16.vlgmr.msra.gmra.mxu0 %vm679_vm0, %v3104_v60  ;;  %2755 = vmatmul.msk.bf16.vlgmr.msra.gmra.mxu3 %vm679_vm0, %v3133_v44  ;;  %v1142_v60 = vld [vmem:[%s4995_s4 + $0x68] sm:$0xff]  ;;  %v1149_v44 = vld [vmem:[%s4995_s4 + $0xa0] sm:$0xff] }
  0x4a   :  { %511 = vperm.xlu1 %3232, %v197_v61   ;;  %v1158_v61 = vld [vmem:[%s4995_s4 + $0xe8] sm:$0xff] }
  0x4b   :  { %416 = vperm.xlu0 %3231, %v178_v62   ;;  %516 = vperm.xlu2 %3233, %v198_v63  }
  0x52   :  { %326 = vperm.xlu1 %3232, %v160_v0  }
  0x53   :  { %321 = vperm.xlu0 %3231, %v159_v1   ;;  %401 = vperm.xlu2 %3233, %v175_v2   ;;  %v1140_v1 = vld [vmem:[%s4995_s4 + $0x58] sm:$0xff]  ;;  %v1139_v2 = vld [vmem:[%s4995_s4 + $0x50] sm:$0xff] }
  0x56   :  { %2727 = vmatmul.msk.bf16.gmra.mxu0 %vm679_vm0, %v3105_v3  ;;  %2756 = vmatmul.msk.bf16.gmra.mxu3 %vm679_vm0, %v3134_v55  ;;  %v1155_v3 = vld [vmem:[%s4995_s4 + $0xd0] sm:$0xff] }
  0x5a   :  { %501 = vperm.xlu1 %3232, %v195_v4   ;;  %v3112_v4 = vld [vmem:[%s4994_s1 + $0x40] sm:$0xff] }
  0x5b   :  { %406 = vperm.xlu0 %3231, %v176_v5   ;;  %506 = vperm.xlu2 %3233, %v196_v6   ;;  %v3135_v5 = vld [vmem:[%s4994_s1 + $0xf8] sm:$0xff] }
  0x5d   :  { %v3574_v39 = vpop.permute.xlu2 %251 }
  0x62   :  { %316 = vperm.xlu1 %3232, %v158_v7  }
  0x63   :  { %311 = vperm.xlu0 %3231, %v157_v8   ;;  %391 = vperm.xlu2 %3233, %v173_v9   ;;  %v1137_v8 = vld [vmem:[%s4995_s4 + $0x40] sm:$0xff] }
  0x65   :  { %v3603_v49 = vpop.permute.xlu2 %256 }
  0x66   :  { %2728 = vmatmul.msk.bf16.gmra.mxu0 %vm679_vm0, %v3106_v10  ;;  %2757 = vmatmul.msk.bf16.gmra.mxu3 %vm679_vm0, %v3135_v5 }
  0x6a   :  { %491 = vperm.xlu1 %3232, %v193_v11   ;;  %v1156_v11 = vld [vmem:[%s4995_s4 + $0xd8] sm:$0xff] }
  0x6b   :  { %396 = vperm.xlu0 %3231, %v174_v12   ;;  %496 = vperm.xlu2 %3233, %v194_v13   ;;  %v1138_v12 = vld [vmem:[%s4995_s4 + $0x48] sm:$0xff] }
  0x6d   :  { %v3624_v57 = vpop.permute.xlu2 %231 }
  0x72   :  { %306 = vperm.xlu1 %3232, %v156_v14  }
  0x73   :  { %301 = vperm.xlu0 %3231, %v155_v15   ;;  %381 = vperm.xlu2 %3233, %v171_v16  }
  0x74   :  { %v3558_v33 = vpop.permute.xlu1 %261 }
  0x75   :  { %v3555_v32 = vpop.permute.xlu0 %271  ;;  %v3639_v63 = vpop.permute.xlu2 %226 }
  0x76   :  { %2729 = vmatmul.msk.bf16.gmra.mxu0 %vm679_vm0, %v3107_v17 }
  0x7a   :  { %481 = vperm.xlu1 %3232, %v191_v18   ;;  %v1154_v18 = vld [vmem:[%s4995_s4 + $0xc8] sm:$0xff] }
  0x7b   :  { %386 = vperm.xlu0 %3231, %v172_v19   ;;  %486 = vperm.xlu2 %3233, %v192_v20  }
  0x7c   :  { %v3576_v40 = vpop.permute.xlu1 %266 }
  0x7d   :  { %v3569_v37 = vpop.permute.xlu0 %276  ;;  %v202_v9 = vpop.permute.xlu2 %201 }
  0x82   :  { %296 = vperm.xlu1 %3232, %v154_v21   ;;  %v1153_v21 = vld [vmem:[%s4995_s4 + $0xc0] sm:$0xff] }
  0x83   :  { %291 = vperm.xlu0 %3231, %v153_v22   ;;  %371 = vperm.xlu2 %3233, %v169_v23   ;;  %v1135_v22 = vld [vmem:[%s4995_s4 + $0x30] sm:$0xff]  ;;  %v3113_v23 = vld [vmem:[%s4994_s1 + $0x48] sm:$0xff] }
  0x84   :  { %v3605_v50 = vpop.permute.xlu1 %246 }
  0x85   :  { %v3595_v46 = vpop.permute.xlu0 %241 }
  0x86   :  { %2730 = vmatmul.msk.bf16.gmra.mxu0 %vm679_vm0, %v3108_v24 }
  0x8a   :  { %471 = vperm.xlu1 %3232, %v189_v25  }
  0x8b   :  { %376 = vperm.xlu0 %3231, %v170_v26   ;;  %476 = vperm.xlu2 %3233, %v190_v27   ;;  %v1151_v26 = vld [vmem:[%s4995_s4 + $0xb0] sm:$0xff]  ;;  %v1136_v27 = vld [vmem:[%s4995_s4 + $0x38] sm:$0xff] }
  0x8c   :  { %v3626_v58 = vpop.permute.xlu1 %221 }
  0x8d   :  { %v3622_v56 = vpop.permute.xlu0 %236 }
  0x92   :  { %286 = vperm.xlu1 %3232, %v152_v28   ;;  %v1152_v28 = vld [vmem:[%s4995_s4 + $0xb8] sm:$0xff] }
  0x93   :  { %281 = vperm.xlu0 %3231, %v151_v29   ;;  %361 = vperm.xlu2 %3233, %v167_v30  }
  0x94   :  { %v217_v0 = vpop.permute.xlu1 %216 }
  0x95   :  { %v212_v62 = vpop.permute.xlu0 %211 }
  0x96   :  { %2731 = vmatmul.msk.bf16.gmra.mxu0 %vm679_vm0, %v3109_v31 }
  0x9a   :  { %461 = vperm.xlu1 %3232, %v187_v34  }
  0x9b   :  { %366 = vperm.xlu0 %3231, %v168_v35   ;;  %466 = vperm.xlu2 %3233, %v188_v36  }
  0x9c   :  { %v3661_v10 = vpop.permute.xlu1 %351 }
  0x9d   :  { %v207_v7 = vpop.permute.xlu0 %206 }
  0xa2   :  { %456 = vperm.xlu1 %3232, %v186_v38  }
  0xa3   :  { %451 = vperm.xlu0 %3231, %v185_v41   ;;  %441 = vperm.xlu2 %3233, %v183_v42   ;;  %v1134_v41 = vld [vmem:[%s4995_s4 + $0x28] sm:$0xff] }
  0xa4   :  { %v3685_v24 = vpop.permute.xlu1 %436 }
  0xa5   :  { %v3674_v20 = vpop.permute.xlu0 %431 }
  0xa6   :  { %2732 = vmatmul.msk.bf16.gmra.mxu0 %vm679_vm0, %v3110_v43  ;;  %v1133_v43 = vld [vmem:[%s4995_s4 + $0x20] sm:$0xff] }
  0xaa   :  { %1233 = vperm.xlu1 %3232, %v1143_v45   ;;  %v3114_v45 = vld [vmem:[%s4994_s1 + $0x50] sm:$0xff] }
  0xab   :  { %446 = vperm.xlu0 %3231, %v184_v47   ;;  %1238 = vperm.xlu2 %3233, %v1144_v48  }
  0xac   :  { %v3699_v35 = vpop.permute.xlu1 %421 }
  0xad   :  { %v3697_v30 = vpop.permute.xlu0 %346 }
  0xb2   :  { %1318 = vperm.xlu1 %3232, %v1160_v51  }
  0xb3   :  { %1313 = vperm.xlu0 %3231, %v1159_v52   ;;  %1223 = vperm.xlu2 %3233, %v1141_v53   ;;  %v1131_v52 = vld [vmem:[%s4995_s4 + $0x10] sm:$0xff]  ;;  %v1150_v53 = vld [vmem:[%s4995_s4 + $0xa8] sm:$0xff] }
  0xb4   :  { %v3718_v51 = vpop.permute.xlu1 %336 }
  0xb5   :  { %v3715_v48 = vpop.permute.xlu0 %331 }
  0xb6   :  { %2733 = vmatmul.msk.bf16.gmra.mxu0 %vm679_vm0, %v3111_v54  ;;  %v1132_v54 = vld [vmem:[%s4995_s4 + $0x18] sm:$0xff] }
  0xba   :  { %1303 = vperm.xlu1 %3232, %v1157_v59  }
  0xbb   :  { %1228 = vperm.xlu0 %3231, %v1142_v60   ;;  %1308 = vperm.xlu2 %3233, %v1158_v61  }
  0xc2   :  { %1218 = vperm.xlu1 %3232, %v1140_v1   ;;  %v1148_v1 = vld [vmem:[%s4995_s4 + $0x98] sm:$0xff] }
  0xc3   :  { %v809_v6 = vpop.f32.mrf.mxu0  ;;  %1213 = vperm.xlu0 %3231, %v1139_v2   ;;  %1293 = vperm.xlu2 %3233, %v1155_v3   ;;  %v3738_v3 = vpop.permute.xlu1 %511 }
  0xc4   :  { %v810_v13 = vadd.f32 %v809_v6, %v202_v9  ;;  %v1130_v9 = vld [vmem:[%s4995_s4 + $0x8] sm:$0xff] }
  0xc6   :  { %2734 = vmatmul.msk.bf16.gmra.mxu0 %vm679_vm0, %v3112_v4  ;;  %v969_v16 = vmax.f32 %v810_v13, 0.0  ;;  %v3115_v4 = vld [vmem:[%s4994_s1 + $0x58] sm:$0xff] }
  0xca   :  { %1203 = vperm.xlu1 %3232, %v1137_v8  }
  0xcb   :  { %v811_v14 = vpop.f32.mrf.mxu0  ;;  %1298 = vperm.xlu0 %3231, %v1156_v11   ;;  %1208 = vperm.xlu2 %3233, %v1138_v12   ;;  %v1146_v11 = vld [vmem:[%s4995_s4 + $0x88] sm:$0xff]  ;;  %v3762_v12 = vpop.permute.xlu1 %326 }
  0xcc   :  { %v812_v15 = vadd.f32 %v811_v14, %v207_v7  ;;  %v1145_v7 = vld [vmem:[%s4995_s4 + $0x80] sm:$0xff] }
  0xce   :  { %v970_v17 = vmax.f32 %v812_v15, 0.0 }
  0xd0   :  { %v3672_v19 = vpack.c.bf16 %v970_v17, %v969_v16  ;;  %v2076_v16 = vld [vmem:[%s4996_s6 + $0x78] sm:$0xff] }
  0xd2   :  { %1288 = vperm.xlu1 %3232, %v1154_v18   ;;  %v2075_v18 = vld [vmem:[%s4996_s6 + $0x70] sm:$0xff] }
  0xd3   :  { %v814_v25 = vpop.f32.mrf.mxu0  ;;  %1283 = vperm.xlu0 %3231, %v1153_v21   ;;  %1193 = vperm.xlu2 %3233, %v1135_v22   ;;  %v2073_v21 = vld [vmem:[%s4996_s6 + $0x60] sm:$0xff] }
  0xd4   :  { %v815_v29 = vadd.f32 %v814_v25, %v212_v62  ;;  %v3783_v25 = vpop.permute.xlu1 %501 }
  0xd6   :  { %2735 = vmatmul.msk.bf16.gmra.mxu0 %vm679_vm0, %v3113_v23  ;;  %v971_v36 = vmax.f32 %v815_v29, 0.0  ;;  %v3795_v29 = vpop.permute.xlu2 %356 }
  0xda   :  { %1273 = vperm.xlu1 %3232, %v1151_v26   ;;  %v2071_v26 = vld [vmem:[%s4996_s6 + $0x50] sm:$0xff] }
  0xdb   :  { %v816_v31 = vpop.f32.mrf.mxu0  ;;  %1198 = vperm.xlu0 %3231, %v1136_v27   ;;  %1278 = vperm.xlu2 %3233, %v1152_v28   ;;  %v2074_v27 = vld [vmem:[%s4996_s6 + $0x68] sm:$0xff]  ;;  %v2072_v28 = vld [vmem:[%s4996_s6 + $0x58] sm:$0xff] }
  0xdc   :  { %v817_v34 = vadd.f32 %v816_v31, %v217_v0  ;;  %v3731_v0 = vpop.permute.xlu0 %416 }
  0xde   :  { %v972_v38 = vmax.f32 %v817_v34, 0.0 }
  0xe0   :  { %v3704_v42 = vpack.c.bf16 %v972_v38, %v971_v36  ;;  %v3801_v36 = vpop.permute.xlu1 %316  ;;  %v2070_v38 = vld [vmem:[%s4996_s6 + $0x48] sm:$0xff] }
  0xe2   :  { %1188 = vperm.xlu1 %3232, %v1134_v41   ;;  %v2069_v41 = vld [vmem:[%s4996_s6 + $0x40] sm:$0xff] }
  0xe3   :  { %v819_v47 = vpop.f32.mrf.mxu0  ;;  %1183 = vperm.xlu0 %3231, %v1133_v43   ;;  %1263 = vperm.xlu2 %3233, %v1149_v44   ;;  %v2067_v43 = vld [vmem:[%s4996_s6 + $0x30] sm:$0xff]  ;;  %v3117_v44 = vld [vmem:[%s4994_s1 + $0x68] sm:$0xff] }
  0xe4   :  { %v820_v55 = vadd.f32 %v819_v47, %v3626_v58  ;;  %v1147_v58 = vld [vmem:[%s4995_s4 + $0x90] sm:$0xff]  ;;  %v3754_v8 = vpop.permute.xlu0 %321  ;;  %v3817_v47 = vpop.permute.xlu2 %341 }
  0xe6   :  { %2736 = vmatmul.msk.bf16.gmra.mxu0 %vm679_vm0, %v3114_v45  ;;  %v973_v61 = vmax.f32 %v820_v55, 0.0  ;;  %v2068_v55 = vld [vmem:[%s4996_s6 + $0x38] sm:$0xff] }
  0xea   :  { %1173 = vperm.xlu1 %3232, %v1131_v52  }
  0xeb   :  { %v821_v59 = vpop.f32.mrf.mxu0  ;;  %1268 = vperm.xlu0 %3231, %v1150_v53   ;;  %1178 = vperm.xlu2 %3233, %v1132_v54   ;;  %v2065_v53 = vld [vmem:[%s4996_s6 + $0x20] sm:$0xff]  ;;  %v3825_v54 = vpop.permute.xlu1 %491 }
  0xec   :  { %v822_v60 = vadd.f32 %v821_v59, %v3639_v63  ;;  %v1129_v63 = vld [vmem:[%s4995_s4] sm:$0xff]  ;;  %v3779_v22 = vpop.permute.xlu0 %406  ;;  %v2066_v59 = vld [vmem:[%s4996_s6 + $0x28] sm:$0xff] }
  0xee   :  { %v974_v62 = vmax.f32 %v822_v60, 0.0 }
  0xf0   :  { %v3736_v2 = vpack.c.bf16 %v974_v62, %v973_v61  ;;  %v3833_v61 = vpop.permute.xlu2 %426  ;;  %v2064_v62 = vld [vmem:[%s4996_s6 + $0x18] sm:$0xff] }
  0xf2   :  { %1258 = vperm.xlu1 %3232, %v1148_v1  }
  0xf3   :  { %v824_v5 = vpop.f32.mrf.mxu0  ;;  %1253 = vperm.xlu0 %3231, %v1147_v58   ;;  %1163 = vperm.xlu2 %3233, %v1129_v63   ;;  %v2063_v58 = vld [vmem:[%s4996_s6 + $0x10] sm:$0xff]  ;;  %v2061_v63 = vld [vmem:[%s4996_s6] sm:$0xff] }
  0xf4   :  { %v825_v6 = vadd.f32 %v824_v5, %v3624_v57  ;;  %v3799_v34 = vpop.permute.xlu0 %311  ;;  %v3849_v5 = vpop.permute.xlu1 %306 }
  0xf6   :  { %2737 = vmatmul.msk.bf16.gmra.mxu0 %vm679_vm0, %v3115_v4  ;;  %v975_v14 = vmax.f32 %v825_v6, 0.0  ;;  %v3118_v4 = vld [vmem:[%s4994_s1 + $0x70] sm:$0xff] }
  0xfa   :  { %1243 = vperm.xlu1 %3232, %v1145_v7   ;;  %v3852_v7 = vpop.permute.xlu2 %411 }
  0xfb   :  { %v826_v57 = vpop.f32.mrf.mxu0  ;;  %1168 = vperm.xlu0 %3231, %v1130_v9   ;;  %1248 = vperm.xlu2 %3233, %v1146_v11   ;;  %v2373_v9 = vld [vmem:[%s4997_s8 + $0x30] sm:$0xff]  ;;  %v3857_v11 = vpop.f32.mrf.mxu3 }
  0xfc   :  { %v827_v13 = vadd.f32 %v826_v57, %v3622_v56  ;;  %v3116_v56 = vld [vmem:[%s4994_s1 + $0x60] sm:$0xff]  ;;  %v3820_v52 = vpop.permute.xlu0 %396  ;;  %v2062_v57 = vld [vmem:[%s4996_s6 + $0x8] sm:$0xff] }
  0xfe   :  { %v976_v15 = vmax.f32 %v827_v13, 0.0  ;;  %v2374_v13 = vld [vmem:[%s4997_s8 + $0x38] sm:$0xff] }
 0x100   :  { %v3768_v17 = vpack.c.bf16 %v976_v15, %v975_v14 }
 0x102   :  { %2154 = vperm.xlu1 %3232, %v2076_v16   ;;  %v18_v16 = vstv %s4998_s12 }
 0x103   :  { %v3781_v23 = vpop.f32.mrf.mxu0  ;;  %2149 = vperm.xlu0 %3231, %v2075_v18   ;;  %2139 = vperm.xlu2 %3233, %v2073_v21   ;;  %19 = vst [vmem:[#allocation2] sm:$0x1] %v18_v16  ;;  %v3870_v18 = vpop.permute.xlu1 %481  ;;  %v2372_v21 = vld [vmem:[%s4997_s8 + $0x28] sm:$0xff] }
 0x104   :  { %v3838_v1 = vpop.permute.xlu0 %301 }
 0x106   :  { %2738 = vmatmul.msk.bf16.gmra.mxu0 %vm679_vm0, %v3116_v56  ;;  %v3875_v56 = vpop.f32.mrf.mxu3 }
 0x10a   :  { %2129 = vperm.xlu1 %3232, %v2071_v26   ;;  %v2371_v26 = vld [vmem:[%s4997_s8 + $0x20] sm:$0xff] }
 0x10b   :  { %v3797_v31 = vpop.f32.mrf.mxu0  ;;  %2144 = vperm.xlu0 %3231, %v2074_v27   ;;  %2134 = vperm.xlu2 %3233, %v2072_v28   ;;  %v2369_v27 = vld [vmem:[%s4997_s8 + $0x10] sm:$0xff]  ;;  %v3883_v28 = vpop.permute.xlu2 %516 }
 0x10c   :  { %v3865_v14 = vpop.permute.xlu0 %386 }
 0x112   :  { %2124 = vperm.xlu1 %3232, %v2070_v38   ;;  %v3119_v38 = vld [vmem:[%s4994_s1 + $0x78] sm:$0xff] }
 0x113   :  { %v3815_v45 = vpop.f32.mrf.mxu0  ;;  %2119 = vperm.xlu0 %3231, %v2069_v41   ;;  %2109 = vperm.xlu2 %3233, %v2067_v43  }
 0x114   :  { %v3888_v43 = vpop.permute.xlu0 %291 }
 0x116   :  { %2739 = vmatmul.msk.bf16.gmra.mxu0 %vm679_vm0, %v3117_v44  ;;  %v3891_v44 = vpop.permute.xlu1 %296 }
 0x11a   :  { %2099 = vperm.xlu1 %3232, %v2065_v53   ;;  %v2367_v53 = vld [vmem:[%s4997_s8] sm:$0xff] }
 0x11b   :  { %v836_v60 = vpop.f32.mrf.mxu0  ;;  %2114 = vperm.xlu0 %3231, %v2068_v55   ;;  %2104 = vperm.xlu2 %3233, %v2066_v59   ;;  %v3896_v55 = vpop.f32.mrf.mxu3  ;;  %v2370_v59 = vld [vmem:[%s4997_s8 + $0x18] sm:$0xff] }
 0x122   :  { %2094 = vperm.xlu1 %3232, %v2064_v62   ;;  %v2368_v62 = vld [vmem:[%s4997_s8 + $0x8] sm:$0xff] }
 0x123   :  { %v839_v6 = vpop.f32.mrf.mxu0  ;;  %2089 = vperm.xlu0 %3231, %v2063_v58   ;;  %2079 = vperm.xlu2 %3233, %v2061_v63  }
 0x126   :  { %2740 = vmatmul.msk.bf16.gmra.mxu0 %vm679_vm0, %v3118_v4  ;;  %v3905_v4 = vpop.permute.xlu2 %401 }
 0x12a   :  { %2407 = vperm.xlu1 %3232, %v2373_v9  }
 0x12b   :  { %v841_v15 = vpop.f32.mrf.mxu0  ;;  %2084 = vperm.xlu0 %3231, %v2062_v57   ;;  %2412 = vperm.xlu2 %3233, %v2374_v13   ;;  %v840_v13 = vadd.f32 %v839_v6, %v3558_v33  ;;  %v2486_v33 = vld [vmem:[%s4999_s10 + $0x10] sm:$0xff]  ;;  %v3120_v6 = vld [vmem:[%s4994_s1 + $0x80] sm:$0xff] }
 0x12c   :  { %v842_v9 = vadd.f32 %v841_v15, %v3576_v40  ;;  %v3916_v40 = vpop.permute.xlu1 %471 }
 0x132   :  { %2402 = vperm.xlu1 %3232, %v2372_v21  }
 0x133   :  { %v844_v41 = vpop.f32.mrf.mxu0  ;;  %2397 = vperm.xlu0 %3231, %v2371_v26   ;;  %2387 = vperm.xlu2 %3233, %v2369_v27   ;;  %v3910_v26 = vpop.permute.xlu0 %376  ;;  %v837_v27 = vadd.f32 %v836_v60, %v3603_v49  ;;  %v835_v49 = vadd.f32 %v3815_v45, %v3574_v39  ;;  %v981_v60 = vmax.f32 %v840_v13, 0.0  ;;  %v2548_v13 = vld [vmem:[%s5000_s11] sm:$0xff] }
 0x134   :  { %v845_v58 = vadd.f32 %v844_v41, %v3555_v32  ;;  %v2485_v41 = vld [vmem:[%s4999_s10 + $0x8] sm:$0xff] }
 0x135   :  { %v979_v39 = vmax.f32 %v835_v49, 0.0 }
 0x136   :  { %2741 = vmatmul.msk.bf16.gmra.mxu0 %vm679_vm0, %v3119_v38  ;;  %v983_v16 = vmax.f32 %v845_v58, 0.0  ;;  %v982_v38 = vmax.f32 %v842_v9, 0.0  ;;  %v830_v9 = vadd.f32 %v3781_v23, %v3595_v46  ;;  %v2549_v46 = vld [vmem:[%s5000_s11 + $0x8] sm:$0xff] }
 0x138   :  { %v1039_v58 = vpack.c.bf16 %v982_v38, %v981_v60  ;;  %v977_v23 = vmax.f32 %v830_v9, 0.0  ;;  %v2551_v60 = vld [vmem:[%s5000_s11 + $0x18] sm:$0xff] }
 0x13a   :  { %2377 = vperm.xlu1 %3232, %v2367_v53   ;;  %v961_v53 = vpop.f32.mrf.mxu3 }
 0x13b   :  { %v846_v63 = vpop.f32.mrf.mxu0  ;;  %2392 = vperm.xlu0 %3231, %v2370_v59   ;;  %2382 = vperm.xlu2 %3233, %v2368_v62   ;;  %v832_v59 = vadd.f32 %v3797_v31, %v3605_v50  ;;  %v980_v62 = vmax.f32 %v837_v27, 0.0  ;;  %v282_v50 = vpop.permute.xlu0 %281  ;;  %v2487_v31 = vld [vmem:[%s4999_s10 + $0x18] sm:$0xff] }
 0x13c   :  { %v847_v57 = vadd.f32 %v846_v63, %v3569_v37  ;;  %v2484_v37 = vld [vmem:[%s4999_s10] sm:$0xff]  ;;  %v507_v63 = vpop.permute.xlu2 %506  ;;  %v287_v27 = vpop.permute.xlu1 %286 }
 0x13d   :  { %v978_v45 = vmax.f32 %v832_v59, 0.0 }
 0x13e   :  { %v984_v21 = vmax.f32 %v847_v57, 0.0  ;;  %v1038_v57 = vpack.c.bf16 %v980_v62, %v979_v39  ;;  %v2585_v62 = vld [vmem:[#allocation2] sm:$0x1] }
 0x140   :  { %v1040_v32 = vpack.c.bf16 %v984_v21, %v983_v16 }
 0x142   :  { %1641 = vmatpush.bf16.msra.mxu1 %v1040_v32  ;;  %2495 = vperm.xlu1 %3232, %v2485_v41   ;;  %v964_v16 = vpop.f32.mrf.mxu3  ;;  %v1037_v41 = vpack.c.bf16 %v978_v45, %v977_v23 }
 0x143   :  { %v849_v15 = vpop.f32.mrf.mxu0  ;;  %2490 = vperm.xlu0 %3231, %v2484_v37   ;;  %2500 = vperm.xlu2 %3233, %v2486_v33   ;;  %v965_v39 = vadd.f32 %v964_v16, %v3738_v3 }
 0x144   :  { %v850_v21 = vadd.f32 %v849_v15, %v282_v50  ;;  %v3943_v49 = vpop.permute.xlu2 %391  ;;  %v2550_v15 = vld [vmem:[%s5000_s11 + $0x10] sm:$0xff] }
 0x146   :  { %2742 = vmatmul.msk.bf16.gmra.mxu0 %vm679_vm0, %v3120_v6  ;;  %1642 = vmatpush.bf16.msra.mxu1 %v1039_v58  ;;  %v985_v37 = vmax.f32 %v850_v21, 0.0  ;;  %v3121_v58 = vld [vmem:[%s4994_s1 + $0x88] sm:$0xff] }
 0x14a   :  { %1643 = vmatpush.bf16.msra.mxu1 %v1038_v57  ;;  %2554 = vperm.xlu1 %3232, %v2548_v13   ;;  %v966_v6 = vpop.f32.mrf.mxu3  ;;  %v960_v57 = vadd.f32 %v3896_v55, %v3783_v25  ;;  %v1031_v13 = vmax.f32 %v965_v39, 0.0 }
 0x14b   :  { %v851_v38 = vpop.f32.mrf.mxu0  ;;  %2505 = vperm.xlu0 %3231, %v2487_v31   ;;  %2559 = vperm.xlu2 %3233, %v2549_v46   ;;  %v967_v45 = vadd.f32 %v966_v6, %v3883_v28  ;;  %v955_v46 = vadd.f32 %v3857_v11, %v3825_v54  ;;  %v2760_v28 = vld [vmem:[%s5001_s3] sm:$0xf] }
 0x14c   :  { %v852_v32 = vadd.f32 %v851_v38, %v287_v27  ;;  %v497_v31 = vpop.permute.xlu2 %496  ;;  %v1029_v55 = vmax.f32 %v960_v57, 0.0 }
 0x14d   :  { %v1032_v50 = vmax.f32 %v967_v45, 0.0  ;;  %v957_v25 = vadd.f32 %v3875_v56, %v497_v31  ;;  %v3122_v56 = vld [vmem:[%s4994_s1 + $0x90] sm:$0xff]  ;;  %v2792_v45 = vld [vmem:[%s5001_s3 + $0x40] sm:$0xf] }
 0x14e   :  { %v986_v33 = vmax.f32 %v852_v32, 0.0  ;;  %1644 = vmatpush.bf16.msra.mxu1 %v1037_v41 }
 0x14f   :  { %v1064_v16 = vpack.c.bf16 %v1032_v50, %v1031_v13  ;;  %v1028_v21 = vmax.f32 %v957_v25, 0.0 }
 0x150   :  { %v3948_v59 = vpack.c.bf16 %v986_v33, %v985_v37  ;;  %v3142_v37 = vld [vmem:[%s5001_s3 + $0x2c] sm:$0xf0] }
 0x152   :  { %1645 = vmatpush.bf16.msra.mxu1 %v3768_v17  ;;  %2569 = vperm.xlu1 %3232, %v2551_v60   ;;  %v962_v17 = vadd.f32 %v961_v53, %v507_v63 }
 0x153   :  { %v854_v9 = vpop.f32.mrf.mxu0  ;;  %2564 = vperm.xlu0 %3231, %v2550_v15   ;;  %2588 = vperm.xlu2 %3233, %v2585_v62  }
 0x154   :  { %v855_v3 = vadd.f32 %v854_v9, %v3888_v43  ;;  %v1030_v63 = vmax.f32 %v962_v17, 0.0 }
 0x156   :  { %2743 = vmatmul.msk.bf16.gmra.mxu0 %vm679_vm0, %v3121_v58  ;;  %1646 = vmatpush.bf16.msra.mxu1 %v3736_v2  ;;  %v3138_v2 = vld [vmem:[%s5001_s3 + $0xc] sm:$0xf0]  ;;  %v987_v43 = vmax.f32 %v855_v3, 0.0  ;;  %v1063_v27 = vpack.c.bf16 %v1030_v63, %v1029_v55  ;;  %v3125_v55 = vld [vmem:[%s4994_s1 + $0xa8] sm:$0xff]  ;;  %v2824_v63 = vld [vmem:[%s5001_s3 + $0x80] sm:$0xf] }
 0x157   :  { %v2761_v11 = vor.u32 %v3138_v2, %v2760_v28  ;;  %v2808_v28 = vld [vmem:[%s5001_s3 + $0x60] sm:$0xf] }
 0x15a   :  { %1647 = vmatpush.bf16.msra.mxu1 %v3704_v42  ;;  %v1027_v42 = vmax.f32 %v955_v46, 0.0 }
 0x15b   :  { %v856_v53 = vpop.f32.mrf.mxu0 }
 0x15c   :  { %v857_v54 = vadd.f32 %v856_v53, %v3891_v44  ;;  %v1062_v41 = vpack.c.bf16 %v1028_v21, %v1027_v42  ;;  %v2840_v21 = vld [vmem:[%s5001_s3 + $0xa0] sm:$0xf] }
 0x15e   :  { %v988_v23 = vmax.f32 %v857_v54, 0.0  ;;  %1648 = vmatpush.bf16.msra.mxu1 %v3672_v19  ;;  %v2776_v19 = vld [vmem:[%s5001_s3 + $0x20] sm:$0xf] }
 0x15f   :  { %v2777_v6 = vor.u32 %v3142_v37, %v2776_v19 }
 0x160   :  { %v3976_v38 = vpack.c.bf16 %v988_v23, %v987_v43  ;;  %v4026_v43 = vpop.permute.xlu2 %381  ;;  %v3126_v23 = vld [vmem:[%s4994_s1 + $0xb0] sm:$0xff] }
 0x161   :  { %1649 = vmatmul.bf16.vlgmr.msra.gmra.mxu1 %v2761_v11 }
 0x162   :  { %1908 = vmatpush.bf16.msrb.mxu1 %v1064_v16  ;;  %v3154_v16 = vld [vmem:[%s5001_s3 + $0x8c] sm:$0xf0] }
 0x163   :  { %v859_v32 = vpop.f32.mrf.mxu0  ;;  %v2825_v11 = vor.u32 %v3154_v16, %v2824_v63  ;;  %v2872_v16 = vld [vmem:[%s5001_s3 + $0xe0] sm:$0xf] }
 0x164   :  { %v860_v44 = vadd.f32 %v859_v32, %v3838_v1  ;;  %v3123_v1 = vld [vmem:[%s4994_s1 + $0x98] sm:$0xff] }
 0x166   :  { %1909 = vmatpush.bf16.msrb.mxu1 %v1063_v27  ;;  %2744 = vmatmul.msk.bf16.gmra.mxu0 %vm679_vm0, %v3122_v56  ;;  %v989_v15 = vmax.f32 %v860_v44, 0.0  ;;  %v3158_v27 = vld [vmem:[%s5001_s3 + $0xac] sm:$0xf0]  ;;  %v3127_v44 = vld [vmem:[%s4994_s1 + $0xb8] sm:$0xff] }
 0x168   :  { %v4038_v56 = vpop.permute.xlu2 %486 }
 0x16a   :  { %1910 = vmatpush.bf16.msrb.mxu1 %v1062_v41  ;;  %v2841_v41 = vor.u32 %v3158_v27, %v2840_v21  ;;  %v3129_v27 = vld [vmem:[%s4994_s1 + $0xc8] sm:$0xff] }
 0x16b   :  { %v861_v33 = vpop.f32.mrf.mxu0 }
 0x16c   :  { %v862_v60 = vadd.f32 %v861_v33, %v3849_v5  ;;  %v3146_v5 = vld [vmem:[%s5001_s3 + $0x4c] sm:$0xf0] }
 0x16d   :  { %v2793_v13 = vor.u32 %v3146_v5, %v2792_v45 }
 0x16e   :  { %v990_v62 = vmax.f32 %v862_v60, 0.0  ;;  %v2856_v60 = vld [vmem:[%s5001_s3 + $0xc0] sm:$0xf] }
 0x170   :  { %v3990_v58 = vpack.c.bf16 %v990_v62, %v989_v15  ;;  %v372_v37 = vpop.permute.xlu2 %371 }
 0x171   :  { %1654 = vmatmul.bf16.gmra.mxu1 %v2777_v6  ;;  %v3162_v6 = vld [vmem:[%s5001_s3 + $0xcc] sm:$0xf0] }
 0x173   :  { %v864_v9 = vpop.f32.mrf.mxu0 }
 0x174   :  { %v865_v39 = vadd.f32 %v864_v9, %v3799_v34  ;;  %v3124_v34 = vld [vmem:[%s4994_s1 + $0xa0] sm:$0xff]  ;;  %v2857_v9 = vor.u32 %v3162_v6, %v2856_v60 }
 0x176   :  { %2745 = vmatmul.msk.bf16.gmra.mxu0 %vm679_vm0, %v3123_v1  ;;  %v991_v50 = vmax.f32 %v865_v39, 0.0 }
 0x17b   :  { %v866_v57 = vpop.f32.mrf.mxu0 }
 0x17c   :  { %v867_v17 = vadd.f32 %v866_v57, %v3801_v36  ;;  %v3150_v36 = vld [vmem:[%s5001_s3 + $0x6c] sm:$0xf0]  ;;  %v4054_v57 = vpop.permute.xlu2 %476 }
 0x17d   :  { %v2809_v25 = vor.u32 %v3150_v36, %v2808_v28 }
 0x17e   :  { %v992_v31 = vmax.f32 %v867_v17, 0.0 }
 0x180   :  { %v4004_v46 = vpack.c.bf16 %v992_v31, %v991_v50 }
 0x181   :  { %1659 = vmatmul.bf16.gmra.mxu1 %v2793_v13 }
 0x183   :  { %v869_v3 = vpop.f32.mrf.mxu0 }
 0x184   :  { %v870_v36 = vadd.f32 %v869_v3, %v3754_v8 }
 0x186   :  { %2746 = vmatmul.msk.bf16.gmra.mxu0 %vm679_vm0, %v3124_v34 }
 0x18b   :  { %v871_v2 = vpop.f32.mrf.mxu0 }
 0x191   :  { %1664 = vmatmul.bf16.gmra.mxu1 %v2809_v25 }
 0x193   :  { %v874_v53 = vpop.f32.mrf.mxu0 }
 0x194   :  { %v875_v50 = vadd.f32 %v874_v53, %v3715_v48  ;;  %v362_v48 = vpop.permute.xlu2 %361  ;;  %v993_v53 = vmax.f32 %v870_v36, 0.0 }
 0x196   :  { %2747 = vmatmul.msk.bf16.gmra.mxu0 %vm679_vm0, %v3125_v55  ;;  %v995_v25 = vmax.f32 %v875_v50, 0.0 }
 0x19b   :  { %v876_v54 = vpop.f32.mrf.mxu0 }
 0x19c   :  { %v4122_v36 = vpop.permute.xlu2 %466 }
 0x1a1   :  { %1669 = vmatmul.bf16.gmra.mxu1 %v2825_v11 }
 0x1a3   :  { %v879_v42 = vpop.f32.mrf.mxu0 }
 0x1a4   :  { %v880_v39 = vadd.f32 %v879_v42, %v3817_v47  ;;  %v872_v47 = vadd.f32 %v871_v2, %v3762_v12  ;;  %v3166_v12 = vld [vmem:[%s5001_s3 + $0xec] sm:$0xf0]  ;;  %v367_v2 = vpop.permute.xlu0 %366 }
 0x1a5   :  { %v2873_v11 = vor.u32 %v3166_v12, %v2872_v16 }
 0x1a6   :  { %2748 = vmatmul.msk.bf16.gmra.mxu0 %vm679_vm0, %v3126_v23  ;;  %v997_v31 = vmax.f32 %v880_v39, 0.0 }
 0x1ab   :  { %v881_v32 = vpop.f32.mrf.mxu0 }
 0x1ac   :  { %v882_v62 = vadd.f32 %v881_v32, %v3697_v30  ;;  %v3128_v30 = vld [vmem:[%s4994_s1 + $0xc0] sm:$0xff]  ;;  %v4140_v16 = vpop.permute.xlu0 %451 }
 0x1ae   :  { %v998_v17 = vmax.f32 %v882_v62, 0.0 }
 0x1b0   :  { %v1047_v28 = vpack.c.bf16 %v998_v17, %v997_v31 }
 0x1b1   :  { %1674 = vmatmul.bf16.gmra.mxu1 %v2841_v41  ;;  %v2888_v41 = vld [vmem:[%s5001_s3 + $0x100] sm:$0xf] }
 0x1b3   :  { %v884_v19 = vpop.f32.mrf.mxu0 }
 0x1b4   :  { %v885_v33 = vadd.f32 %v884_v19, %v3661_v10  ;;  %v877_v10 = vadd.f32 %v876_v54, %v3718_v51  ;;  %v994_v51 = vmax.f32 %v872_v47, 0.0  ;;  %v3136_v19 = vld [vmem:[%s5001_s3 + $0x4] sm:$0xf] }
 0x1b6   :  { %2749 = vmatmul.msk.bf16.gmra.mxu0 %vm679_vm0, %v3127_v44  ;;  %v999_v45 = vmax.f32 %v885_v33, 0.0  ;;  %v996_v34 = vmax.f32 %v877_v10, 0.0  ;;  %v1045_v54 = vpack.c.bf16 %v994_v51, %v993_v53  ;;  %v2762_v33 = vld [vmem:[%s5001_s3 + $0x10] sm:$0xf0] }
 0x1b7   :  { %v2778_v10 = vld [vmem:[%s5001_s3 + $0x30] sm:$0xf0] }
 0x1b8   :  { %v1046_v55 = vpack.c.bf16 %v996_v34, %v995_v25  ;;  %v3131_v34 = vld [vmem:[%s4994_s1 + $0xd8] sm:$0xff]  ;;  %v2920_v25 = vld [vmem:[%s5001_s3 + $0x140] sm:$0xf]  ;;  %v2794_v53 = vld [vmem:[%s5001_s3 + $0x50] sm:$0xf0] }
 0x1bb   :  { %v886_v15 = vpop.f32.mrf.mxu0 }
 0x1bc   :  { %v887_v1 = vadd.f32 %v886_v15, %v3795_v29  ;;  %v2765_v15 = vor.u32 %v3136_v19, %v2762_v33  ;;  %v2810_v19 = vld [vmem:[%s5001_s3 + $0x70] sm:$0xf0] }
 0x1be   :  { %v1000_v5 = vmax.f32 %v887_v1, 0.0  ;;  %v3130_v1 = vld [vmem:[%s4994_s1 + $0xd0] sm:$0xff] }
 0x1c0   :  { %v1048_v13 = vpack.c.bf16 %v1000_v5, %v999_v45  ;;  %v3140_v5 = vld [vmem:[%s5001_s3 + $0x24] sm:$0xf] }
 0x1c1   :  { %1679 = vmatmul.bf16.gmra.mxu1 %v2857_v9 }
 0x1c2   :  { %1730 = vmatpush.bf16.msra.mxu2 %v1048_v13 }
 0x1c3   :  { %v889_v29 = vpop.f32.mrf.mxu0 }
 0x1c4   :  { %v890_v63 = vadd.f32 %v889_v29, %v362_v48  ;;  %v3144_v48 = vld [vmem:[%s5001_s3 + $0x44] sm:$0xf] }
 0x1c6   :  { %2750 = vmatmul.msk.bf16.gmra.mxu0 %vm679_vm0, %v3128_v30  ;;  %1731 = vmatpush.bf16.msra.mxu2 %v1047_v28  ;;  %v1001_v23 = vmax.f32 %v890_v63, 0.0  ;;  %v2781_v30 = vor.u32 %v3140_v5, %v2778_v10  ;;  %v3186_v5 = vld [vmem:[%s5001_s3 + $0x18c] sm:$0xf0]  ;;  %v3152_v10 = vld [vmem:[%s5001_s3 + $0x84] sm:$0xf] }
 0x1ca   :  { %1732 = vmatpush.bf16.msra.mxu2 %v1046_v55  ;;  %v3178_v55 = vld [vmem:[%s5001_s3 + $0x14c] sm:$0xf0] }
 0x1cb   :  { %v891_v8 = vpop.f32.mrf.mxu0 }
 0x1cc   :  { %v892_v3 = vadd.f32 %v891_v8, %v367_v2  ;;  %v2921_v2 = vor.u32 %v3178_v55, %v2920_v25  ;;  %v2797_v8 = vor.u32 %v3144_v48, %v2794_v53  ;;  %v2968_v48 = vld [vmem:[%s5001_s3 + $0x1a0] sm:$0xf]  ;;  %v3190_v53 = vld [vmem:[%s5001_s3 + $0x1ac] sm:$0xf0] }
 0x1ce   :  { %v1002_v42 = vmax.f32 %v892_v3, 0.0  ;;  %1733 = vmatpush.bf16.msra.mxu2 %v1045_v54 }
 0x1d0   :  { %v4070_v21 = vpack.c.bf16 %v1002_v42, %v1001_v23  ;;  %v3132_v42 = vld [vmem:[%s4994_s1 + $0xe0] sm:$0xff] }
 0x1d1   :  { %1684 = vmatmul.bf16.gmra.mxu1 %v2873_v11 }
 0x1d2   :  { %1734 = vmatpush.bf16.msra.mxu2 %v4004_v46  ;;  %v3170_v46 = vld [vmem:[%s5001_s3 + $0x10c] sm:$0xf0] }
 0x1d3   :  { %v894_v32 = vpop.f32.mrf.mxu0  ;;  %v2889_v6 = vor.u32 %v3170_v46, %v2888_v41  ;;  %v2936_v41 = vld [vmem:[%s5001_s3 + $0x160] sm:$0xf]  ;;  %v3148_v46 = vld [vmem:[%s5001_s3 + $0x64] sm:$0xf] }
 0x1d4   :  { %v895_v44 = vadd.f32 %v894_v32, %v372_v37  ;;  %v4154_v32 = vpop.permute.xlu0 %446 }
 0x1d6   :  { %2751 = vmatmul.msk.bf16.gmra.mxu0 %vm679_vm0, %v3129_v27  ;;  %1735 = vmatpush.bf16.msra.mxu2 %v3990_v58  ;;  %v1003_v37 = vmax.f32 %v895_v44, 0.0  ;;  %v3182_v44 = vld [vmem:[%s5001_s3 + $0x16c] sm:$0xf0] }
 0x1da   :  { %1736 = vmatpush.bf16.msra.mxu2 %v3976_v38 }
 0x1db   :  { %v896_v58 = vpop.f32.mrf.mxu0 }
 0x1dc   :  { %v897_v60 = vadd.f32 %v896_v58, %v3910_v26  ;;  %v2904_v26 = vld [vmem:[%s5001_s3 + $0x120] sm:$0xf] }
 0x1de   :  { %v1004_v62 = vmax.f32 %v897_v60, 0.0  ;;  %1737 = vmatpush.bf16.msra.mxu2 %v3948_v59  ;;  %v4098_v9 = vpop.f32.mrf.mxu1  ;;  %v3174_v59 = vld [vmem:[%s5001_s3 + $0x12c] sm:$0xf0]  ;;  %v2937_v60 = vor.u32 %v3182_v44, %v2936_v41 }
 0x1df   :  { %v2905_v31 = vor.u32 %v3174_v59, %v2904_v26 }
 0x1e0   :  { %v4093_v38 = vpack.c.bf16 %v1004_v62, %v1003_v37  ;;  %v4177_v37 = vpop.permute.xlu0 %1313 }
 0x1e1   :  { %1689 = vmatmul.bf16.gmra.mxu1 %v2889_v6  ;;  %1738 = vmatmul.bf16.vlgmr.msra.gmra.mxu2 %v2765_v15  ;;  %v2813_v6 = vor.u32 %v3148_v46, %v2810_v19  ;;  %v4175_v15 = vpop.permute.xlu1 %461  ;;  %5006 = vst [vmem:[#allocation3_spill] sm:$0xff] %v4177_v37 }
 0x1e3   :  { %v899_v39 = vpop.f32.mrf.mxu0 }
 0x1e4   :  { %v900_v45 = vadd.f32 %v899_v39, %v4026_v43 }
 0x1e6   :  { %2752 = vmatmul.msk.bf16.gmra.mxu0 %vm679_vm0, %v3130_v1  ;;  %v4115_v50 = vpop.f32.mrf.mxu1  ;;  %v1005_v43 = vmax.f32 %v900_v45, 0.0  ;;  %v2952_v45 = vld [vmem:[%s5001_s3 + $0x180] sm:$0xf] }
 0x1e8   :  { %v4188_v59 = vpop.permute.xlu0 %1228 }
 0x1e9   :  { %v4183_v26 = vpop.permute.xlu1 %456 }
 0x1eb   :  { %v901_v17 = vpop.f32.mrf.mxu0 }
 0x1ec   :  { %v902_v13 = vadd.f32 %v901_v17, %v3865_v14  ;;  %v2826_v17 = vld [vmem:[%s5001_s3 + $0x90] sm:$0xf0] }
 0x1ee   :  { %v1006_v29 = vmax.f32 %v902_v13, 0.0  ;;  %v4125_v14 = vpop.f32.mrf.mxu1 }
 0x1f0   :  { %v4117_v47 = vpack.c.bf16 %v1006_v29, %v1005_v43  ;;  %v2829_v43 = vor.u32 %v3152_v10, %v2826_v17  ;;  %v4205_v25 = vpop.permute.xlu0 %1213  ;;  %v3194_v10 = vld [vmem:[%s5001_s3 + $0x1cc] sm:$0xf0]  ;;  %v3160_v17 = vld [vmem:[%s5001_s3 + $0xc4] sm:$0xf] }
 0x1f1   :  { %1694 = vmatmul.bf16.gmra.mxu1 %v2905_v31  ;;  %1743 = vmatmul.bf16.gmra.mxu2 %v2781_v30  ;;  %v2953_v30 = vor.u32 %v3186_v5, %v2952_v45 }
 0x1f3   :  { %v904_v28 = vpop.f32.mrf.mxu0 }
 0x1f4   :  { %v905_v51 = vadd.f32 %v904_v28, %v3943_v49  ;;  %v4143_v49 = vpop.permute.xlu2 %441 }
 0x1f6   :  { %2753 = vmatmul.msk.bf16.gmra.mxu0 %vm679_vm0, %v3131_v34  ;;  %v1007_v3 = vmax.f32 %v905_v51, 0.0  ;;  %v4147_v23 = vpop.f32.mrf.mxu1  ;;  %v4203_v34 = vpop.permute.xlu1 %1233 }
 0x1fb   :  { %v906_v63 = vpop.f32.mrf.mxu0 }
 0x1fc   :  { %v907_v12 = vadd.f32 %v906_v63, %v3820_v52  ;;  %v4157_v52 = vpop.permute.xlu2 %1238  ;;  %v3156_v63 = vld [vmem:[%s5001_s3 + $0xa4] sm:$0xf] }
 0x1fe   :  { %v1008_v54 = vmax.f32 %v907_v12, 0.0  ;;  %v4171_v33 = vpop.f32.mrf.mxu1  ;;  %v2842_v12 = vld [vmem:[%s5001_s3 + $0xb0] sm:$0xf0] }
 0x200   :  { %v4145_v11 = vpack.c.bf16 %v1008_v54, %v1007_v3  ;;  %v2969_v3 = vor.u32 %v3190_v53, %v2968_v48  ;;  %v2845_v54 = vor.u32 %v3156_v63, %v2842_v12 }
 0x201   :  { %1699 = vmatmul.bf16.gmra.mxu1 %v2921_v2  ;;  %1748 = vmatmul.bf16.gmra.mxu2 %v2797_v8  ;;  %v4223_v8 = vpop.permute.xlu1 %1318 }
 0x202   :  { %5009 = vst [vmem:[#allocation6_spill] sm:$0xff] %v4223_v8 }
 0x203   :  { %v4152_v27 = vpop.f32.mrf.mxu0 }
 0x204   :  { %v4179_v62 = vpop.permute.xlu2 %1223 }
 0x206   :  { %2754 = vmatmul.msk.bf16.gmra.mxu0 %vm679_vm0, %v3132_v42  ;;  %v4181_v39 = vpop.f32.mrf.mxu1  ;;  %v4225_v42 = vpop.permute.xlu0 %1298 }
 0x207   :  { %5010 = vst [vmem:[#allocation7_spill] sm:$0xff] %v4225_v42 }
 0x209   :  { %v4231_v19 = vpop.permute.xlu1 %1303 }
 0x20a   :  { %5011 = vst [vmem:[#allocation8_spill] sm:$0xff] %v4231_v19 }
 0x20b   :  { %v4173_v58 = vpop.f32.mrf.mxu0 }
 0x20c   :  { %v4199_v31 = vpop.permute.xlu2 %1308 }
 0x20d   :  { %5007 = vst [vmem:[#allocation4_spill] sm:$0xff] %v4199_v31 }
 0x20e   :  { %v4201_v29 = vpop.f32.mrf.mxu1 }
 0x211   :  { %1704 = vmatmul.bf16.gmra.mxu1 %v2937_v60  ;;  %1753 = vmatmul.bf16.gmra.mxu2 %v2813_v6  ;;  %v4233_v60 = vpop.permute.xlu0 %1283  ;;  %v2984_v6 = vld [vmem:[%s5001_s3 + $0x1c0] sm:$0xf] }
 0x213   :  { %v914_v1 = vpop.f32.mrf.mxu0 }
 0x214   :  { %v4207_v51 = vpop.permute.xlu2 %1293 }
 0x215   :  { %5008 = vst [vmem:[#allocation5_spill] sm:$0xff] %v4207_v51  ;;  %v4255_v51 = vpop.permute.xlu1 %1218 }
 0x216   :  { %v4209_v55 = vpop.f32.mrf.mxu1 }
 0x219   :  { %v4258_v31 = vpop.permute.xlu0 %1198 }
 0x21b   :  { %v916_v13 = vpop.f32.mrf.mxu0 }
 0x21c   :  { %v4227_v41 = vpop.permute.xlu2 %1208  ;;  %v917_v42 = vadd.f32 %v916_v13, %v3731_v0  ;;  %v910_v0 = vadd.f32 %v4152_v27, %v3905_v4  ;;  %v3198_v4 = vld [vmem:[%s5001_s3 + $0x1ec] sm:$0xf0]  ;;  %v3164_v27 = vld [vmem:[%s5001_s3 + $0xe4] sm:$0xf] }
 0x21e   :  { %v4229_v44 = vpop.f32.mrf.mxu1 }
 0x221   :  { %1709 = vmatmul.bf16.gmra.mxu1 %v2953_v30  ;;  %1758 = vmatmul.bf16.gmra.mxu2 %v2829_v43  ;;  %v2858_v30 = vld [vmem:[%s5001_s3 + $0xd0] sm:$0xf0] }
 0x222   :  { %v2861_v12 = vor.u32 %v3160_v17, %v2858_v30 }
 0x223   :  { %v919_v28 = vpop.f32.mrf.mxu0 }
 0x224   :  { %v4238_v45 = vpop.permute.xlu2 %1193 }
 0x226   :  { %v4252_v63 = vpop.f32.mrf.mxu1 }
 0x227   :  { %5012 = vst [vmem:[#allocation9_spill] sm:$0xff] %v4252_v63 }
 0x22b   :  { %v921_v2 = vpop.f32.mrf.mxu0 }
 0x22c   :  { %v922_v48 = vadd.f32 %v921_v2, %v3833_v61 }
 0x22e   :  { %v1014_v19 = vmax.f32 %v922_v48, 0.0 }
 0x231   :  { %1714 = vmatmul.bf16.gmra.mxu1 %v2969_v3  ;;  %1763 = vmatmul.bf16.gmra.mxu2 %v2845_v54  ;;  %v920_v3 = vadd.f32 %v919_v28, %v3699_v35  ;;  %v912_v35 = vadd.f32 %v4173_v58, %v3779_v22  ;;  %v1012_v28 = vmax.f32 %v917_v42, 0.0  ;;  %v2874_v58 = vld [vmem:[%s5001_s3 + $0xf0] sm:$0xf0] }
 0x233   :  { %v924_v46 = vpop.f32.mrf.mxu0  ;;  %v1013_v61 = vmax.f32 %v920_v3, 0.0  ;;  %v1010_v17 = vmax.f32 %v912_v35, 0.0  ;;  %v3168_v35 = vld [vmem:[%s5001_s3 + $0x104] sm:$0xf] }
 0x234   :  { %v925_v5 = vadd.f32 %v924_v46, %v3674_v20  ;;  %v2985_v20 = vor.u32 %v3194_v10, %v2984_v6  ;;  %v4261_v6 = vpop.permute.xlu2 %1278  ;;  %v4267_v10 = vpop.f32.mrf.mxu1 }
 0x235   :  { %5013 = vst [vmem:[#allocation10_spill] sm:$0xff] %v4261_v6 }
 0x236   :  { %v1015_v54 = vmax.f32 %v925_v5, 0.0  ;;  %v1055_v5 = vpack.c.bf16 %v1014_v19, %v1013_v61  ;;  %v4284_v19 = vpop.permute.xlu0 %1183 }
 0x23b   :  { %v926_v43 = vpop.f32.mrf.mxu0 }
 0x23c   :  { %v927_v53 = vadd.f32 %v926_v43, %v3685_v24  ;;  %v915_v24 = vadd.f32 %v914_v1, %v3852_v7  ;;  %v1009_v7 = vmax.f32 %v910_v0, 0.0  ;;  %v3000_v1 = vld [vmem:[%s5001_s3 + $0x1e0] sm:$0xf] }
 0x23e   :  { %v1016_v46 = vmax.f32 %v927_v53, 0.0  ;;  %v1011_v13 = vmax.f32 %v915_v24, 0.0  ;;  %v1053_v48 = vpack.c.bf16 %v1010_v17, %v1009_v7  ;;  %v2877_v53 = vor.u32 %v3164_v27, %v2874_v58 }
 0x240   :  { %v1056_v8 = vpack.c.bf16 %v1016_v46, %v1015_v54  ;;  %v1054_v30 = vpack.c.bf16 %v1012_v28, %v1011_v13  ;;  %v4291_v46 = vpop.f32.mrf.mxu1  ;;  %v2890_v28 = vld [vmem:[%s5001_s3 + $0x110] sm:$0xf0] }
 0x241   :  { %1719 = vmatmul.bf16.gmra.mxu1 %v2985_v20  ;;  %1768 = vmatmul.bf16.gmra.mxu2 %v2861_v12  ;;  %v4287_v20 = vpop.permute.xlu2 %1263  ;;  %v2893_v13 = vor.u32 %v3168_v35, %v2890_v28 }
 0x242   :  { %1819 = vmatpush.bf16.msrb.mxu3 %v1056_v8  ;;  %v4272_v8 = vpop.permute.xlu1 %1203 }
 0x243   :  { %v929_v2 = vpop.f32.mrf.mxu0 }
 0x244   :  { %v930_v22 = vadd.f32 %v929_v2, %v4143_v49  ;;  %v3001_v49 = vor.u32 %v3198_v4, %v3000_v1 }
 0x246   :  { %1820 = vmatpush.bf16.msrb.mxu3 %v1055_v5  ;;  %v1017_v12 = vmax.f32 %v930_v22, 0.0  ;;  %v3139_v5 = vld [vmem:[%s5001_s3 + $0x14] sm:$0xf0] }
 0x249   :  { %v1179_v2 = vpop.permute.xlu2 %1178 }
 0x24a   :  { %1821 = vmatpush.bf16.msrb.mxu3 %v1054_v30  ;;  %v4296_v61 = vpop.permute.xlu1 %1288 }
 0x24b   :  { %v931_v42 = vpop.f32.mrf.mxu0  ;;  %5014 = vst [vmem:[#allocation11_spill] sm:$0xff] %v4296_v61 }
 0x24c   :  { %v932_v43 = vadd.f32 %v931_v42, %v4154_v32  ;;  %v4298_v32 = vpop.permute.xlu0 %1268 }
 0x24d   :  { %5015 = vst [vmem:[#allocation12_spill] sm:$0xff] %v4298_v32 }
 0x24e   :  { %v1018_v3 = vmax.f32 %v932_v43, 0.0  ;;  %1822 = vmatpush.bf16.msrb.mxu3 %v1053_v48  ;;  %v3172_v43 = vld [vmem:[%s5001_s3 + $0x124] sm:$0xf]  ;;  %v2906_v48 = vld [vmem:[%s5001_s3 + $0x130] sm:$0xf0] }
 0x24f   :  { %v2909_v28 = vor.u32 %v3172_v43, %v2906_v48  ;;  %v2922_v43 = vld [vmem:[%s5001_s3 + $0x150] sm:$0xf0]  ;;  %v1658_v48 = vadd.f32 %v4147_v23, %v1179_v2  ;;  %v3180_v23 = vld [vmem:[%s5001_s3 + $0x164] sm:$0xf] }
 0x250   :  { %v4289_v54 = vpack.c.bf16 %v1018_v3, %v1017_v12 }
 0x251   :  { %1724 = vmatmul.bf16.gmra.mxu1 %v3001_v49  ;;  %1773 = vmatmul.bf16.gmra.mxu2 %v2877_v53  ;;  %v1164_v7 = vpop.permute.xlu2 %1163  ;;  %v3143_v49 = vld [vmem:[%s5001_s3 + $0x34] sm:$0xf0] }
 0x252   :  { %1823 = vmatpush.bf16.msrb.mxu3 %v4145_v11  ;;  %v2768_v11 = vld [vmem:[%s5001_s3 + $0x8] sm:$0xf]  ;;  %v4318_v30 = vpop.permute.xlu1 %1273  ;;  %v1651_v1 = vadd.f32 %v4098_v9, %v1164_v7 }
 0x253   :  { %v4294_v24 = vpop.f32.mrf.mxu0  ;;  %v2769_v17 = vor.u32 %v3139_v5, %v2768_v11  ;;  %v2784_v9 = vld [vmem:[%s5001_s3 + $0x28] sm:$0xf] }
 0x254   :  { %v2785_v11 = vor.u32 %v3143_v49, %v2784_v9 }
 0x256   :  { %1824 = vmatpush.bf16.msrb.mxu3 %v4117_v47  ;;  %v4314_v47 = vpop.f32.mrf.mxu1 }
 0x25a   :  { %1825 = vmatpush.bf16.msrb.mxu3 %v4093_v38  ;;  %v4321_v38 = vpop.permute.xlu0 %1253  ;;  %v1189_v42 = vpop.permute.xlu1 %1188 }
 0x25b   :  { %v4316_v0 = vpop.f32.mrf.mxu0 }
 0x25e   :  { %1826 = vmatpush.bf16.msrb.mxu3 %v4070_v21  ;;  %v4326_v27 = vpop.f32.mrf.mxu1 }
 0x261   :  { %1778 = vmatmul.bf16.gmra.mxu2 %v2893_v13  ;;  %1827 = vmatmul.bf16.vlgmr.msrb.gmra.mxu3 %v2769_v17 }
 0x262   :  { %v1169_v21 = vpop.permute.xlu0 %1168  ;;  %v1174_v13 = vpop.permute.xlu1 %1173 }
 0x263   :  { %v4324_v22 = vpop.f32.mrf.mxu0  ;;  %v1653_v53 = vadd.f32 %v4115_v50, %v1169_v21  ;;  %v1656_v17 = vadd.f32 %v4125_v14, %v1174_v13  ;;  %v3176_v50 = vld [vmem:[%s5001_s3 + $0x144] sm:$0xf]  ;;  %v2800_v21 = vld [vmem:[%s5001_s3 + $0x48] sm:$0xf]  ;;  %v3147_v14 = vld [vmem:[%s5001_s3 + $0x54] sm:$0xf0] }
 0x264   :  { %v1739_v4 = vpop.f32.mrf.mxu2 }
 0x265   :  { %v4328_v58 = vadd.f32 %v1739_v4, %v1651_v1 }
 0x266   :  { %v4345_v5 = vpop.f32.mrf.mxu1 }
 0x26b   :  { %v941_v12 = vpop.f32.mrf.mxu0 }
 0x26c   :  { %v1741_v3 = vpop.f32.mrf.mxu2  ;;  %v942_v32 = vadd.f32 %v941_v12, %v4122_v36  ;;  %v935_v36 = vadd.f32 %v4294_v24, %v4140_v16  ;;  %v2832_v16 = vld [vmem:[%s5001_s3 + $0x88] sm:$0xf] }
 0x26d   :  { %v4343_v35 = vadd.f32 %v1741_v3, %v1653_v53  ;;  %v2925_v3 = vor.u32 %v3176_v50, %v2922_v43  ;;  %v2938_v50 = vld [vmem:[%s5001_s3 + $0x170] sm:$0xf0]  ;;  %v1663_v43 = vadd.f32 %v4181_v39, %v1189_v42  ;;  %v1666_v42 = vadd.f32 %v4201_v29, %v4238_v45  ;;  %v3184_v29 = vld [vmem:[%s5001_s3 + $0x184] sm:$0xf]  ;;  %v3155_v45 = vld [vmem:[%s5001_s3 + $0x94] sm:$0xf0] }
 0x26e   :  { %v4350_v61 = vpop.f32.mrf.mxu1 }
 0x271   :  { %1783 = vmatmul.bf16.gmra.mxu2 %v2909_v28  ;;  %1832 = vmatmul.bf16.gmra.mxu3 %v2785_v11  ;;  %v2801_v28 = vor.u32 %v3147_v14, %v2800_v21  ;;  %v1661_v11 = vadd.f32 %v4171_v33, %v4284_v19  ;;  %v2816_v33 = vld [vmem:[%s5001_s3 + $0x68] sm:$0xf]  ;;  %v3151_v19 = vld [vmem:[%s5001_s3 + $0x74] sm:$0xf0] }
 0x273   :  { %v944_v7 = vpop.f32.mrf.mxu0 }
 0x274   :  { %v1744_v1 = vpop.f32.mrf.mxu2 }
 0x275   :  { %v4348_v4 = vadd.f32 %v1744_v1, %v1656_v17 }
 0x276   :  { %v4369_v13 = vpop.f32.mrf.mxu1 }
 0x27b   :  { %v946_v9 = vpop.f32.mrf.mxu0 }
 0x27c   :  { %v1746_v49 = vpop.f32.mrf.mxu2  ;;  %v947_v14 = vadd.f32 %v946_v9, %v4054_v57  ;;  %v937_v9 = vadd.f32 %v4316_v0, %v4183_v26  ;;  %v2954_v26 = vld [vmem:[%s5001_s3 + $0x190] sm:$0xf0] }
 0x27d   :  { %v4365_v53 = vadd.f32 %v1746_v49, %v1658_v48 }
 0x27e   :  { %v4389_v49 = vpop.f32.mrf.mxu1  ;;  %v1024_v63 = vmax.f32 %v947_v14, 0.0 }
 0x281   :  { %1788 = vmatmul.bf16.gmra.mxu2 %v2925_v3  ;;  %1837 = vmatmul.bf16.gmra.mxu3 %v2801_v28  ;;  %v2941_v28 = vor.u32 %v3180_v23, %v2938_v50  ;;  %v1019_v50 = vmax.f32 %v935_v36, 0.0  ;;  %v2864_v36 = vld [vmem:[%s5001_s3 + $0xc8] sm:$0xf] }
 0x283   :  { %v949_v17 = vpop.f32.mrf.mxu0 }
 0x284   :  { %v1749_v1 = vpop.f32.mrf.mxu2  ;;  %v950_v2 = vadd.f32 %v949_v17, %v3870_v18  ;;  %v945_v17 = vadd.f32 %v944_v7, %v3916_v40  ;;  %v1022_v40 = vmax.f32 %v942_v32, 0.0 }
 0x285   :  { %v4371_v37 = vadd.f32 %v1749_v1, %v1661_v11  ;;  %v2817_v11 = vor.u32 %v3151_v19, %v2816_v33  ;;  %v2957_v33 = vor.u32 %v3184_v29, %v2954_v26  ;;  %v2833_v19 = vor.u32 %v3155_v45, %v2832_v16  ;;  %v3145_v29 = vld [vmem:[%s5001_s3 + $0x4c] sm:$0xf]  ;;  %v2802_v26 = vld [vmem:[%s5001_s3 + $0x58] sm:$0xf0] }
 0x286   :  { %v1025_v1 = vmax.f32 %v950_v2, 0.0  ;;  %v1023_v57 = vmax.f32 %v945_v17, 0.0  ;;  %v4405_v2 = vpop.f32.mrf.mxu1  ;;  %v2848_v17 = vld [vmem:[%s5001_s3 + $0xa8] sm:$0xf]  ;;  %v2805_v45 = vor.u32 %v3145_v29, %v2802_v26 }
 0x288   :  { %v1060_v23 = vpack.c.bf16 %v1024_v63, %v1023_v57  ;;  %v1668_v63 = vadd.f32 %v4209_v55, %v4258_v31  ;;  %v1671_v55 = vadd.f32 %v4229_v44, %v4272_v8  ;;  %v3159_v44 = vld [vmem:[%s5001_s3 + $0xb4] sm:$0xf0]  ;;  %v2786_v57 = vld [vmem:[%s5001_s3 + $0x38] sm:$0xf0] }
 0x28b   :  { %v951_v21 = vpop.f32.mrf.mxu0 }
 0x28c   :  { %v952_v48 = vadd.f32 %v951_v21, %v4038_v56  ;;  %v1751_v18 = vpop.f32.mrf.mxu2  ;;  %v940_v56 = vadd.f32 %v4324_v22, %v4175_v15  ;;  %v1020_v15 = vmax.f32 %v937_v9, 0.0  ;;  %v2770_v21 = vld [vmem:[%s5001_s3 + $0x18] sm:$0xf0] }
 0x28d   :  { %v4391_v3 = vadd.f32 %v1751_v18, %v1663_v43  ;;  %v3137_v43 = vld [vmem:[%s5001_s3 + $0xc] sm:$0xf] }
 0x28e   :  { %v1026_v6 = vmax.f32 %v952_v48, 0.0  ;;  %v1021_v12 = vmax.f32 %v940_v56, 0.0  ;;  %v1058_v32 = vpack.c.bf16 %v1020_v15, %v1019_v50  ;;  %v4429_v14 = vpop.f32.mrf.mxu1  ;;  %v2773_v31 = vor.u32 %v3137_v43, %v2770_v21  ;;  %v3141_v56 = vld [vmem:[%s5001_s3 + $0x2c] sm:$0xf]  ;;  %v3167_v43 = vld [vmem:[%s5001_s3 + $0xf4] sm:$0xf0] }
 0x290   :  { %v1061_v39 = vpack.c.bf16 %v1026_v6, %v1025_v1  ;;  %v1059_v22 = vpack.c.bf16 %v1022_v40, %v1021_v12  ;;  %v3163_v12 = vld [vmem:[%s5001_s3 + $0xd4] sm:$0xf0] }
 0x291   :  { %1793 = vmatmul.bf16.gmra.mxu2 %v2941_v28  ;;  %1842 = vmatmul.bf16.gmra.mxu3 %v2817_v11  ;;  %v3188_v28 = vld [vmem:[%s5001_s3 + $0x1a4] sm:$0xf]  ;;  %v2970_v11 = vld [vmem:[%s5001_s3 + $0x1b0] sm:$0xf0]  ;;  %v2865_v50 = vor.u32 %v3163_v12, %v2864_v36  ;;  %v2834_v36 = vld [vmem:[%s5001_s3 + $0x98] sm:$0xf0] }
 0x292   :  { %1911 = vmatpush.bf16.msrb.mxu1 %v1061_v39  ;;  %v2973_v1 = vor.u32 %v3188_v28, %v2970_v11  ;;  %v2849_v39 = vor.u32 %v3159_v44, %v2848_v17  ;;  %v2818_v28 = vld [vmem:[%s5001_s3 + $0x78] sm:$0xf0] }
 0x294   :  { %v1754_v7 = vpop.f32.mrf.mxu2 }
 0x295   :  { %v4403_v6 = vadd.f32 %v1754_v7, %v1666_v42  ;;  %v2789_v42 = vor.u32 %v3141_v56, %v2786_v57  ;;  %v3192_v7 = vld [vmem:[%s5001_s3 + $0x1c4] sm:$0xf]  ;;  %v3171_v56 = vld [vmem:[%s5001_s3 + $0x114] sm:$0xf0] }
 0x296   :  { %1912 = vmatpush.bf16.msrb.mxu1 %v1060_v23  ;;  %v4448_v8 = vpop.f32.mrf.mxu1  ;;  %v2986_v23 = vld [vmem:[%s5001_s3 + $0x1d0] sm:$0xf0] }
 0x29a   :  { %1913 = vmatpush.bf16.msrb.mxu1 %v1059_v22  ;;  %v2989_v22 = vor.u32 %v3192_v7, %v2986_v23  ;;  %v3153_v23 = vld [vmem:[%s5001_s3 + $0x8c] sm:$0xf] }
 0x29b   :  { %v2837_v12 = vor.u32 %v3153_v23, %v2834_v36 }
 0x29c   :  { %v1756_v24 = vpop.f32.mrf.mxu2 }
 0x29d   :  { %v4421_v0 = vadd.f32 %v1756_v24, %v1668_v63 }
 0x29e   :  { %1914 = vmatpush.bf16.msrb.mxu1 %v1058_v32  ;;  %v4460_v40 = vpop.f32.mrf.mxu1  ;;  %v3196_v32 = vld [vmem:[%s5001_s3 + $0x1e4] sm:$0xf] }
 0x2a1   :  { %1798 = vmatmul.bf16.gmra.mxu2 %v2957_v33  ;;  %1847 = vmatmul.bf16.gmra.mxu3 %v2833_v19  ;;  %v3002_v33 = vld [vmem:[%s5001_s3 + $0x1f0] sm:$0xf0]  ;;  %v2880_v19 = vld [vmem:[%s5001_s3 + $0xe8] sm:$0xf] }
 0x2a2   :  { %1915 = vmatpush.bf16.msrb.mxu1 %v4289_v54 }
 0x2a4   :  { %v1759_v48 = vpop.f32.mrf.mxu2 }
 0x2a5   :  { %v4434_v18 = vadd.f32 %v1759_v48, %v1671_v55  ;;  %1916 = vmatmul.bf16.vlgmr.msrb.gmra.mxu1 %v2773_v31  ;;  %v3005_v31 = vor.u32 %v3196_v32, %v3002_v33  ;;  %v2881_v55 = vor.u32 %v3167_v43, %v2880_v19  ;;  %v3149_v48 = vld [vmem:[%s5001_s3 + $0x6c] sm:$0xf]  ;;  %v2912_v19 = vld [vmem:[%s5001_s3 + $0x128] sm:$0xf]  ;;  %v3175_v43 = vld [vmem:[%s5001_s3 + $0x134] sm:$0xf0] }
 0x2a6   :  { %v4482_v16 = vpop.f32.mrf.mxu1  ;;  %v2821_v11 = vor.u32 %v3149_v48, %v2818_v28  ;;  %v2913_v48 = vor.u32 %v3175_v43, %v2912_v19  ;;  %v2850_v28 = vld [vmem:[%s5001_s3 + $0xb8] sm:$0xf0] }
 0x2a7   :  { %v2866_v19 = vld [vmem:[%s5001_s3 + $0xd8] sm:$0xf0] }
 0x2ac   :  { %v4450_v54 = vpop.f32.mrf.mxu2 }
 0x2ae   :  { %v4486_v24 = vpop.f32.mrf.mxu1 }
 0x2b1   :  { %1803 = vmatmul.bf16.gmra.mxu2 %v2973_v1  ;;  %1852 = vmatmul.bf16.gmra.mxu3 %v2849_v39  ;;  %v4512_v1 = vpop.permute.xlu1 %1258  ;;  %v2896_v39 = vld [vmem:[%s5001_s3 + $0x108] sm:$0xf] }
 0x2b2   :  { %v2897_v7 = vor.u32 %v3171_v56, %v2896_v39  ;;  %v1696_v56 = vadd.f32 %v4405_v2, %v4321_v38 }
 0x2b4   :  { %v4458_v9 = vpop.f32.mrf.mxu2 }
 0x2b5   :  { %1921 = vmatmul.bf16.gmra.mxu1 %v2789_v42 }
 0x2b6   :  { %v4508_v17 = vpop.f32.mrf.mxu1 }
 0x2bc   :  { %v4474_v15 = vpop.f32.mrf.mxu2 }
 0x2be   :  { %v4522_v42 = vpop.f32.mrf.mxu1 }
 0x2bf   :  { %5016 = vst [vmem:[#allocation13_spill] sm:$0xff] %v4522_v42 }
 0x2c1   :  { %1808 = vmatmul.bf16.gmra.mxu2 %v2989_v22  ;;  %1857 = vmatmul.bf16.gmra.mxu3 %v2865_v50  ;;  %v1244_v22 = vpop.permute.xlu1 %1243 }
 0x2c2   :  { %v1691_v50 = vadd.f32 %v4369_v13, %v1244_v22  ;;  %v3179_v22 = vld [vmem:[%s5001_s3 + $0x154] sm:$0xf0] }
 0x2c4   :  { %v4484_v63 = vpop.f32.mrf.mxu2 }
 0x2c5   :  { %1926 = vmatmul.bf16.gmra.mxu1 %v2805_v45 }
 0x2c6   :  { %v4536_v33 = vpop.f32.mrf.mxu1 }
 0x2c7   :  { %5017 = vst [vmem:[#allocation14_spill] sm:$0xff] %v4536_v33 }
 0x2cc   :  { %v4500_v21 = vpop.f32.mrf.mxu2 }
 0x2d1   :  { %1813 = vmatmul.bf16.gmra.mxu2 %v3005_v31  ;;  %1862 = vmatmul.bf16.gmra.mxu3 %v2881_v55 }
 0x2d4   :  { %v4510_v44 = vpop.f32.mrf.mxu2 }
 0x2d5   :  { %1931 = vmatmul.bf16.gmra.mxu1 %v2821_v11  ;;  %v4555_v11 = vpop.f32.mrf.mxu1 }
 0x2d6   :  { %5018 = vst [vmem:[#allocation15_spill] sm:$0xff] %v4555_v11  ;;  %v3185_v11 = vld [vmem:[%s5001_s3 + $0x18c] sm:$0xf] }
 0x2dc   :  { %v4520_v57 = vpop.f32.mrf.mxu2 }
 0x2e1   :  { %1867 = vmatmul.bf16.gmra.mxu3 %v2897_v7 }
 0x2e4   :  { %v1779_v29 = vpop.f32.mrf.mxu2  ;;  %v1828_v26 = vpop.f32.mrf.mxu3 }
 0x2e5   :  { %v4531_v45 = vadd.f32 %v1779_v29, %v1691_v50  ;;  %v4534_v32 = vadd.f32 %v1828_v26, %v4328_v58  ;;  %1936 = vmatmul.bf16.gmra.mxu1 %v2837_v12  ;;  %v3157_v58 = vld [vmem:[%s5001_s3 + $0xac] sm:$0xf]  ;;  %v2928_v12 = vld [vmem:[%s5001_s3 + $0x148] sm:$0xf]  ;;  %v4570_v50 = vpop.f32.mrf.mxu1 }
 0x2e6   :  { %v2853_v39 = vor.u32 %v3157_v58, %v2850_v28  ;;  %5019 = vst [vmem:[#allocation16_spill] sm:$0xff] %v4570_v50  ;;  %v2929_v26 = vor.u32 %v3179_v22, %v2928_v12  ;;  %v2882_v22 = vld [vmem:[%s5001_s3 + $0xf8] sm:$0xf0] }
 0x2e7   :  { %v3010_v50 = vld [vmem:[%s5001_s3 + $0x1f8] sm:$0xf0] }
 0x2ec   :  { %v4544_v31 = vpop.f32.mrf.mxu2  ;;  %v1830_v13 = vpop.f32.mrf.mxu3 }
 0x2ed   :  { %v4547_v55 = vadd.f32 %v1830_v13, %v4343_v35  ;;  %v1701_v13 = vadd.f32 %v4448_v8, %v4287_v20 }
 0x2f1   :  { %1872 = vmatmul.bf16.gmra.mxu3 %v2913_v48 }
 0x2f4   :  { %v1784_v7 = vpop.f32.mrf.mxu2  ;;  %v1833_v23 = vpop.f32.mrf.mxu3 }
 0x2f5   :  { %v4559_v35 = vadd.f32 %v1784_v7, %v1696_v56  ;;  %v4562_v36 = vadd.f32 %v1833_v23, %v4348_v4  ;;  %1941 = vmatmul.bf16.gmra.mxu1 %v2853_v39  ;;  %v3161_v4 = vld [vmem:[%s5001_s3 + $0xcc] sm:$0xf]  ;;  %v4590_v39 = vpop.f32.mrf.mxu1  ;;  %v2944_v56 = vld [vmem:[%s5001_s3 + $0x168] sm:$0xf]  ;;  %v3183_v7 = vld [vmem:[%s5001_s3 + $0x174] sm:$0xf0] }
 0x2f6   :  { %v2869_v43 = vor.u32 %v3161_v4, %v2866_v19  ;;  %5020 = vst [vmem:[#allocation17_spill] sm:$0xff] %v4590_v39  ;;  %v2945_v12 = vor.u32 %v3183_v7, %v2944_v56  ;;  %v1706_v4 = vadd.f32 %v4482_v16, %v4318_v30  ;;  %v3187_v56 = vld [vmem:[%s5001_s3 + $0x194] sm:$0xf0] }
 0x2fc   :  { %v4572_v29 = vpop.f32.mrf.mxu2  ;;  %v1835_v38 = vpop.f32.mrf.mxu3 }
 0x2fd   :  { %v4575_v2 = vadd.f32 %v1835_v38, %v4365_v53  ;;  %v4609_v38 = vpop.f32.mrf.mxu1 }
 0x2fe   :  { %5021 = vst [vmem:[#allocation18_spill] sm:$0xff] %v4609_v38 }
 0x301   :  { %1877 = vmatmul.bf16.gmra.mxu3 %v2929_v26 }
 0x304   :  { %v1789_v48 = vpop.f32.mrf.mxu2  ;;  %v1838_v58 = vpop.f32.mrf.mxu3 }
 0x305   :  { %v4585_v28 = vadd.f32 %v1789_v48, %v1701_v13  ;;  %v4588_v53 = vadd.f32 %v1838_v58, %v4371_v37  ;;  %1946 = vmatmul.bf16.gmra.mxu1 %v2869_v43  ;;  %v3165_v37 = vld [vmem:[%s5001_s3 + $0xec] sm:$0xf]  ;;  %v4618_v48 = vpop.f32.mrf.mxu1  ;;  %v2960_v58 = vld [vmem:[%s5001_s3 + $0x188] sm:$0xf] }
 0x306   :  { %v2885_v26 = vor.u32 %v3165_v37, %v2882_v22  ;;  %5022 = vst [vmem:[#allocation19_spill] sm:$0xff] %v4618_v48 }
 0x30c   :  { %v4598_v23 = vpop.f32.mrf.mxu2  ;;  %v1840_v20 = vpop.f32.mrf.mxu3 }
 0x30d   :  { %v4601_v8 = vadd.f32 %v1840_v20, %v4391_v3  ;;  %v2961_v20 = vor.u32 %v3187_v56, %v2960_v58 }
 0x311   :  { %1882 = vmatmul.bf16.gmra.mxu3 %v2945_v12  ;;  %v2898_v12 = vld [vmem:[%s5001_s3 + $0x118] sm:$0xf0] }
 0x314   :  { %v1794_v19 = vpop.f32.mrf.mxu2  ;;  %v1843_v43 = vpop.f32.mrf.mxu3 }
 0x315   :  { %v4613_v3 = vadd.f32 %v1794_v19, %v1706_v4  ;;  %v4616_v13 = vadd.f32 %v1843_v43, %v4403_v6  ;;  %1951 = vmatmul.bf16.gmra.mxu1 %v2885_v26  ;;  %v3169_v6 = vld [vmem:[%s5001_s3 + $0x10c] sm:$0xf]  ;;  %v1711_v26 = vadd.f32 %v4508_v17, %v4233_v60 }
 0x316   :  { %v2901_v37 = vor.u32 %v3169_v6, %v2898_v12 }
 0x31c   :  { %v4626_v7 = vpop.f32.mrf.mxu2  ;;  %v1845_v30 = vpop.f32.mrf.mxu3 }
 0x31d   :  { %v4629_v16 = vadd.f32 %v1845_v30, %v4421_v0  ;;  %v2976_v30 = vld [vmem:[%s5001_s3 + $0x1a8] sm:$0xf] }
 0x321   :  { %1887 = vmatmul.bf16.gmra.mxu3 %v2961_v20  ;;  %v3191_v20 = vld [vmem:[%s5001_s3 + $0x1b4] sm:$0xf0] }
 0x322   :  { %v1917_v22 = vpop.f32.mrf.mxu1  ;;  %v2977_v12 = vor.u32 %v3191_v20, %v2976_v30  ;;  %v3195_v30 = vld [vmem:[%s5001_s3 + $0x1d4] sm:$0xf0] }
 0x323   :  { %v1918_v4 = vadd.f32 %v1917_v22, %v4534_v32 }
 0x324   :  { %v1799_v19 = vpop.f32.mrf.mxu2  ;;  %v1848_v0 = vpop.f32.mrf.mxu3 }
 0x325   :  { %v4640_v43 = vadd.f32 %v1799_v19, %v1711_v26  ;;  %v4643_v58 = vadd.f32 %v1848_v0, %v4434_v18  ;;  %1956 = vmatmul.bf16.gmra.mxu1 %v2901_v37  ;;  %v1997_v32 = vmax.f32 %v1918_v4, 0.0  ;;  %v3173_v18 = vld [vmem:[%s5001_s3 + $0x12c] sm:$0xf]  ;;  %v2914_v37 = vld [vmem:[%s5001_s3 + $0x138] sm:$0xf0] }
 0x326   :  { %v2917_v26 = vor.u32 %v3173_v18, %v2914_v37  ;;  %v2930_v18 = vld [vmem:[%s5001_s3 + $0x158] sm:$0xf0] }
 0x32a   :  { %v1919_v56 = vpop.f32.mrf.mxu1 }
 0x32b   :  { %v1920_v60 = vadd.f32 %v1919_v56, %v4547_v55  ;;  %v2992_v56 = vld [vmem:[%s5001_s3 + $0x1c8] sm:$0xf] }
 0x32c   :  { %v4652_v17 = vpop.f32.mrf.mxu3 }
 0x32d   :  { %v1998_v6 = vmax.f32 %v1920_v60, 0.0 }
 0x32f   :  { %v4660_v22 = vpack.c.bf16 %v1998_v6, %v1997_v32 }
 0x331   :  { %1892 = vmatmul.bf16.gmra.mxu3 %v2977_v12  ;;  %v2993_v12 = vor.u32 %v3195_v30, %v2992_v56  ;;  %v3008_v56 = vld [vmem:[%s5001_s3 + $0x1e8] sm:$0xf]  ;;  %v3199_v30 = vld [vmem:[%s5001_s3 + $0x1f4] sm:$0xf0] }
 0x332   :  { %v1922_v19 = vpop.f32.mrf.mxu1 }
 0x333   :  { %v1923_v55 = vadd.f32 %v1922_v19, %v4562_v36  ;;  %v3177_v36 = vld [vmem:[%s5001_s3 + $0x14c] sm:$0xf] }
 0x334   :  { %v4663_v0 = vpop.f32.mrf.mxu3 }
 0x335   :  { %1961 = vmatmul.bf16.gmra.mxu1 %v2917_v26  ;;  %v1999_v32 = vmax.f32 %v1923_v55, 0.0  ;;  %v2933_v26 = vor.u32 %v3177_v36, %v2930_v18  ;;  %v3009_v36 = vor.u32 %v3199_v30, %v3008_v56  ;;  %v2946_v18 = vld [vmem:[%s5001_s3 + $0x178] sm:$0xf0] }
 0x33a   :  { %v1924_v4 = vpop.f32.mrf.mxu1 }
 0x33b   :  { %v1925_v20 = vadd.f32 %v1924_v4, %v4575_v2 }
 0x33c   :  { %v4672_v60 = vpop.f32.mrf.mxu3 }
 0x33d   :  { %v2000_v6 = vmax.f32 %v1925_v20, 0.0 }
 0x33f   :  { %v4680_v37 = vpack.c.bf16 %v2000_v6, %v1999_v32 }
 0x341   :  { %1897 = vmatmul.bf16.gmra.mxu3 %v2993_v12 }
 0x342   :  { %v1927_v19 = vpop.f32.mrf.mxu1 }
 0x343   :  { %v1928_v2 = vadd.f32 %v1927_v19, %v4588_v53  ;;  %v3181_v53 = vld [vmem:[%s5001_s3 + $0x16c] sm:$0xf] }
 0x344   :  { %v4683_v4 = vpop.f32.mrf.mxu3  ;;  %v2949_v19 = vor.u32 %v3181_v53, %v2946_v18 }
 0x345   :  { %1966 = vmatmul.bf16.gmra.mxu1 %v2933_v26  ;;  %v2001_v6 = vmax.f32 %v1928_v2, 0.0 }
 0x34a   :  { %v1929_v55 = vpop.f32.mrf.mxu1 }
 0x34b   :  { %v1930_v20 = vadd.f32 %v1929_v55, %v4601_v8 }
 0x34c   :  { %v4692_v32 = vpop.f32.mrf.mxu3 }
 0x34d   :  { %v2002_v12 = vmax.f32 %v1930_v20, 0.0 }
 0x34f   :  { %v4700_v26 = vpack.c.bf16 %v2002_v12, %v2001_v6  ;;  %v2962_v6 = vld [vmem:[%s5001_s3 + $0x198] sm:$0xf0] }
 0x351   :  { %1902 = vmatmul.bf16.gmra.mxu3 %v3009_v36  ;;  %v2965_v36 = vor.u32 %v3185_v11, %v2962_v6  ;;  %v3193_v6 = vld [vmem:[%s5001_s3 + $0x1cc] sm:$0xf] }
 0x352   :  { %v1932_v42 = vpop.f32.mrf.mxu1 }
 0x353   :  { %v1933_v8 = vadd.f32 %v1932_v42, %v4616_v13 }
 0x354   :  { %v1863_v55 = vpop.f32.mrf.mxu3 }
 0x355   :  { %1971 = vmatmul.bf16.gmra.mxu1 %v2949_v19  ;;  %v2003_v20 = vmax.f32 %v1933_v8, 0.0  ;;  %v3189_v8 = vld [vmem:[%s5001_s3 + $0x1ac] sm:$0xf] }
 0x35a   :  { %v1934_v2 = vpop.f32.mrf.mxu1 }
 0x35b   :  { %v1935_v56 = vadd.f32 %v1934_v2, %v4629_v16 }
 0x35c   :  { %v1865_v30 = vpop.f32.mrf.mxu3 }
 0x35d   :  { %v2004_v33 = vmax.f32 %v1935_v56, 0.0 }
 0x35f   :  { %v4710_v12 = vpack.c.bf16 %v2004_v33, %v2003_v20  ;;  %v2978_v33 = vld [vmem:[%s5001_s3 + $0x1b8] sm:$0xf0] }
 0x360   :  { %v2981_v11 = vor.u32 %v3189_v8, %v2978_v33 }
 0x362   :  { %v1937_v42 = vpop.f32.mrf.mxu1 }
 0x363   :  { %v4713_v13 = vadd.f32 %v1937_v42, %v4643_v58 }
 0x364   :  { %v1868_v53 = vpop.f32.mrf.mxu3 }
 0x365   :  { %v4716_v16 = vadd.f32 %v1868_v53, %v4531_v45  ;;  %1976 = vmatmul.bf16.gmra.mxu1 %v2965_v36  ;;  %v2994_v36 = vld [vmem:[%s5001_s3 + $0x1d8] sm:$0xf0] }
 0x366   :  { %v2997_v42 = vor.u32 %v3193_v6, %v2994_v36  ;;  %v1686_v6 = vadd.f32 %v4345_v5, %v4203_v34 }
 0x36a   :  { %v4718_v18 = vpop.f32.mrf.mxu1 }
 0x36c   :  { %v4720_v19 = vpop.f32.mrf.mxu3 }
 0x372   :  { %v1942_v58 = vpop.f32.mrf.mxu1 }
 0x374   :  { %v1873_v2 = vpop.f32.mrf.mxu3 }
 0x375   :  { %v4729_v56 = vadd.f32 %v1873_v2, %v4559_v35  ;;  %1981 = vmatmul.bf16.gmra.mxu1 %v2981_v11  ;;  %v3197_v2 = vld [vmem:[%s5001_s3 + $0x1ec] sm:$0xf] }
 0x376   :  { %v3013_v48 = vor.u32 %v3197_v2, %v3010_v50  ;;  %v1681_v50 = vadd.f32 %v4314_v47, %v4179_v62 }
 0x37a   :  { %v1944_v45 = vpop.f32.mrf.mxu1 }
 0x37c   :  { %v4731_v20 = vpop.f32.mrf.mxu3 }
 0x382   :  { %v1947_v53 = vpop.f32.mrf.mxu1 }
 0x384   :  { %v1878_v8 = vpop.f32.mrf.mxu3 }
 0x385   :  { %v4740_v33 = vadd.f32 %v1878_v8, %v4585_v28  ;;  %1986 = vmatmul.bf16.gmra.mxu1 %v2997_v42  ;;  %v1683_v28 = vadd.f32 %v4326_v27, %v4188_v59  ;;  %v1688_v42 = vadd.f32 %v4350_v61, %v4157_v52  ;;  %v1775_v8 = vadd.f32 %v4510_v44, %v1686_v6 }
 0x386   :  { %v1678_v59 = vadd.f32 %v4291_v46, %v4255_v51  ;;  %v1770_v27 = vadd.f32 %v4484_v63, %v1681_v50  ;;  %v1249_v50 = vpop.permute.xlu2 %1248 }
 0x387   :  { %v1772_v2 = vadd.f32 %v4500_v21, %v1683_v28  ;;  %v1777_v34 = vadd.f32 %v4520_v57, %v1688_v42  ;;  %v1864_v5 = vadd.f32 %v1863_v55, %v1775_v8  ;;  %v5023_v55 = vld [vmem:[#allocation9_spill] sm:$0xff] }
 0x388   :  { %v1767_v62 = vadd.f32 %v4474_v15, %v1678_v59  ;;  %v1859_v47 = vadd.f32 %v4683_v4, %v1770_v27  ;;  %v1673_v6 = vadd.f32 %v5023_v55, %v4227_v41  ;;  %v3024_v55 = vld [vmem:[%s5002_s5 + $0x10] sm:$0xf] }
 0x389   :  { %v1861_v52 = vadd.f32 %v4692_v32, %v1772_v2  ;;  %v1866_v61 = vadd.f32 %v1865_v30, %v1777_v34 }
 0x38a   :  { %v1949_v35 = vpop.f32.mrf.mxu1  ;;  %v1856_v63 = vadd.f32 %v4672_v60, %v1767_v62 }
 0x38b   :  { %v1950_v21 = vadd.f32 %v1949_v35, %v1861_v52 }
 0x38c   :  { %v4742_v11 = vpop.f32.mrf.mxu3  ;;  %v1945_v15 = vadd.f32 %v1944_v45, %v1856_v63 }
 0x38d   :  { %v2010_v4 = vmax.f32 %v1950_v21, 0.0 }
 0x38e   :  { %v2008_v8 = vmax.f32 %v1945_v15, 0.0 }
 0x392   :  { %v1952_v39 = vpop.f32.mrf.mxu1 }
 0x393   :  { %v1953_v44 = vadd.f32 %v1952_v39, %v1864_v5  ;;  %v1948_v39 = vadd.f32 %v1947_v53, %v1859_v47  ;;  %v2005_v5 = vmax.f32 %v4713_v13, 0.0 }
 0x394   :  { %v1883_v36 = vpop.f32.mrf.mxu3 }
 0x395   :  { %v4758_v38 = vadd.f32 %v1883_v36, %v4613_v3  ;;  %1991 = vmatmul.bf16.gmra.mxu1 %v3013_v48  ;;  %v1676_v3 = vadd.f32 %v4267_v10, %v4205_v25  ;;  %v2011_v32 = vmax.f32 %v1953_v44, 0.0  ;;  %v1762_v25 = vadd.f32 %v4450_v54, %v1673_v6 }
 0x396   :  { %v2009_v41 = vmax.f32 %v1948_v39, 0.0  ;;  %v1693_v54 = vadd.f32 %v4389_v49, %v1249_v50  ;;  %v1698_v44 = vadd.f32 %v4429_v14, %v4512_v1  ;;  %v3207_v50 = vld [vmem:[%s5002_s5 + $0x34] sm:$0xf0] }
 0x397   :  { %v1765_v51 = vadd.f32 %v4458_v9, %v1676_v3  ;;  %v1851_v36 = vadd.f32 %v4652_v17, %v1762_v25  ;;  %v3016_v3 = vld [vmem:[%s5002_s5] sm:$0xf] }
 0x398   :  { %v2035_v53 = vpack.c.bf16 %v2010_v4, %v2009_v41  ;;  %v1782_v17 = vadd.f32 %v4544_v31, %v1693_v54  ;;  %v1787_v13 = vadd.f32 %v4572_v29, %v1698_v44  ;;  %v3032_v4 = vld [vmem:[%s5002_s5 + $0x20] sm:$0xf] }
 0x399   :  { %v1854_v10 = vadd.f32 %v4663_v0, %v1765_v51  ;;  %v1940_v42 = vadd.f32 %v4718_v18, %v1851_v36 }
 0x39a   :  { %v1954_v48 = vpop.f32.mrf.mxu1  ;;  %v1871_v18 = vadd.f32 %v4720_v19, %v1782_v17  ;;  %v1876_v19 = vadd.f32 %v4731_v20, %v1787_v13  ;;  %v5024_v20 = vld [vmem:[#allocation12_spill] sm:$0xff] }
 0x39b   :  { %v1955_v57 = vadd.f32 %v1954_v48, %v1866_v61  ;;  %v1943_v28 = vadd.f32 %v1942_v58, %v1854_v10  ;;  %v2006_v58 = vmax.f32 %v1940_v42, 0.0  ;;  %v1703_v47 = vadd.f32 %v4460_v40, %v5024_v20  ;;  %v4826_v10 = vpop.f32.mrf.mxu2  ;;  %v5030_v20 = vld [vmem:[#allocation6_spill] sm:$0xff] }
 0x39c   :  { %v4775_v46 = vpop.f32.mrf.mxu3 }
 0x39d   :  { %v2012_v30 = vmax.f32 %v1955_v57, 0.0  ;;  %v2007_v0 = vmax.f32 %v1943_v28, 0.0  ;;  %v2033_v27 = vpack.c.bf16 %v2006_v58, %v2005_v5  ;;  %v1792_v21 = vadd.f32 %v4598_v23, %v1703_v47  ;;  %v5031_v47 = vld [vmem:[#allocation19_spill] sm:$0xff] }
 0x39f   :  { %v2036_v35 = vpack.c.bf16 %v2012_v30, %v2011_v32  ;;  %v2034_v34 = vpack.c.bf16 %v2008_v8, %v2007_v0  ;;  %v1881_v57 = vadd.f32 %v4742_v11, %v1792_v21  ;;  %v5025_v11 = vld [vmem:[#allocation10_spill] sm:$0xff]  ;;  %v1728_v21 = vadd.f32 %v5031_v47, %v5030_v20  ;;  %v3034_v20 = vld [vmem:[%s5002_s5 + $0x28] sm:$0xf0]  ;;  %v3206_v47 = vld [vmem:[%s5002_s5 + $0x34] sm:$0xf] }
 0x3a0   :  { %v1708_v30 = vadd.f32 %v4486_v24, %v5025_v11 }
 0x3a1   :  { %2237 = vmatpush.bf16.msrb.mxu2 %v2036_v35  ;;  %v3205_v35 = vld [vmem:[%s5002_s5 + $0x24] sm:$0xf0] }
 0x3a2   :  { %v1957_v9 = vpop.f32.mrf.mxu1  ;;  %v1797_v25 = vadd.f32 %v4626_v7, %v1708_v30  ;;  %v3033_v41 = vor.u32 %v3205_v35, %v3032_v4  ;;  %v3064_v35 = vld [vmem:[%s5002_s5 + $0x60] sm:$0xf] }
 0x3a3   :  { %v1958_v60 = vadd.f32 %v1957_v9, %v4716_v16  ;;  %v1804_v42 = vpop.f32.mrf.mxu2 }
 0x3a4   :  { %v1888_v2 = vpop.f32.mrf.mxu3  ;;  %v1886_v15 = vadd.f32 %v4775_v46, %v1797_v25 }
 0x3a5   :  { %v4785_v45 = vadd.f32 %v1888_v2, %v4640_v43  ;;  %2238 = vmatpush.bf16.msrb.mxu2 %v2035_v53  ;;  %v2013_v52 = vmax.f32 %v1958_v60, 0.0  ;;  %v3040_v53 = vld [vmem:[%s5002_s5 + $0x30] sm:$0xf] }
 0x3a6   :  { %v3041_v0 = vor.u32 %v3207_v50, %v3040_v53 }
 0x3a9   :  { %2239 = vmatpush.bf16.msrb.mxu2 %v2034_v34 }
 0x3aa   :  { %v1959_v16 = vpop.f32.mrf.mxu1 }
 0x3ab   :  { %v1960_v59 = vadd.f32 %v1959_v16, %v1871_v18  ;;  %v1806_v54 = vpop.f32.mrf.mxu2  ;;  %v3209_v18 = vld [vmem:[%s5002_s5 + $0x44] sm:$0xf0] }
 0x3ac   :  { %v4835_v36 = vpop.f32.mrf.mxu3 }
 0x3ad   :  { %v2014_v61 = vmax.f32 %v1960_v59, 0.0  ;;  %2240 = vmatpush.bf16.msrb.mxu2 %v2033_v27 }
 0x3af   :  { %v4790_v49 = vpack.c.bf16 %v2014_v61, %v2013_v52 }
 0x3b1   :  { %2241 = vmatpush.bf16.msrb.mxu2 %v4710_v12  ;;  %v3201_v12 = vld [vmem:[%s5002_s5 + $0x4] sm:$0xf0] }
 0x3b2   :  { %v1962_v43 = vpop.f32.mrf.mxu1  ;;  %v3017_v62 = vor.u32 %v3201_v12, %v3016_v3 }
 0x3b3   :  { %v1963_v31 = vadd.f32 %v1962_v43, %v4729_v56  ;;  %v1809_v34 = vpop.f32.mrf.mxu2  ;;  %v3056_v43 = vld [vmem:[%s5002_s5 + $0x50] sm:$0xf] }
 0x3b4   :  { %v1893_v60 = vpop.f32.mrf.mxu3 }
 0x3b5   :  { %2242 = vmatpush.bf16.msrb.mxu2 %v4700_v26  ;;  %v2015_v14 = vmax.f32 %v1963_v31, 0.0  ;;  %v3211_v31 = vld [vmem:[%s5002_s5 + $0x54] sm:$0xf0] }
 0x3b6   :  { %v3057_v3 = vor.u32 %v3211_v31, %v3056_v43 }
 0x3b9   :  { %2243 = vmatpush.bf16.msrb.mxu2 %v4680_v37 }
 0x3ba   :  { %v1964_v56 = vpop.f32.mrf.mxu1 }
 0x3bb   :  { %v1965_v48 = vadd.f32 %v1964_v56, %v1876_v19  ;;  %v1811_v27 = vpop.f32.mrf.mxu2  ;;  %v5026_v56 = vld [vmem:[#allocation3_spill] sm:$0xff] }
 0x3bc   :  { %v1895_v17 = vpop.f32.mrf.mxu3 }
 0x3bd   :  { %v2016_v1 = vmax.f32 %v1965_v48, 0.0  ;;  %2244 = vmatpush.bf16.msrb.mxu2 %v4660_v22  ;;  %v3203_v22 = vld [vmem:[%s5002_s5 + $0x14] sm:$0xf0] }
 0x3be   :  { %v3025_v63 = vor.u32 %v3203_v22, %v3024_v55  ;;  %v5027_v48 = vld [vmem:[#allocation18_spill] sm:$0xff]  ;;  %v5032_v22 = vld [vmem:[#allocation8_spill] sm:$0xff] }
 0x3bf   :  { %v4807_v29 = vpack.c.bf16 %v2016_v1, %v2015_v14  ;;  %v5028_v1 = vld [vmem:[#allocation4_spill] sm:$0xff] }
 0x3c0   :  { %2245 = vmatmul.bf16.vlgmr.msrb.gmra.mxu2 %v3017_v62  ;;  %v1726_v62 = vadd.f32 %v5027_v48, %v5026_v56 }
 0x3c2   :  { %v1967_v26 = vpop.f32.mrf.mxu1 }
 0x3c3   :  { %v1968_v37 = vadd.f32 %v1967_v26, %v4740_v33  ;;  %v1814_v44 = vpop.f32.mrf.mxu2  ;;  %v5029_v26 = vld [vmem:[#allocation17_spill] sm:$0xff] }
 0x3c4   :  { %v1898_v5 = vpop.f32.mrf.mxu3 }
 0x3c5   :  { %v2017_v39 = vmax.f32 %v1968_v37, 0.0  ;;  %v1723_v37 = vadd.f32 %v5029_v26, %v5028_v1 }
 0x3ca   :  { %v1969_v6 = vpop.f32.mrf.mxu1 }
 0x3cb   :  { %v1970_v51 = vadd.f32 %v1969_v6, %v1881_v57  ;;  %v1816_v14 = vpop.f32.mrf.mxu2  ;;  %v1815_v57 = vadd.f32 %v1814_v44, %v1726_v62  ;;  %v5033_v6 = vld [vmem:[#allocation16_spill] sm:$0xff] }
 0x3cc   :  { %v1900_v52 = vpop.f32.mrf.mxu3 }
 0x3cd   :  { %v2018_v33 = vmax.f32 %v1970_v51, 0.0  ;;  %v1721_v51 = vadd.f32 %v5033_v6, %v5032_v22  ;;  %v3050_v22 = vld [vmem:[%s5002_s5 + $0x48] sm:$0xf0] }
 0x3cf   :  { %v4820_v32 = vpack.c.bf16 %v2018_v33, %v2017_v39  ;;  %v1817_v39 = vadd.f32 %v1816_v14, %v1728_v21  ;;  %v1810_v30 = vadd.f32 %v1809_v34, %v1721_v51  ;;  %v5038_v34 = vld [vmem:[#allocation11_spill] sm:$0xff]  ;;  %v3042_v21 = vld [vmem:[%s5002_s5 + $0x38] sm:$0xf0]  ;;  %v3210_v51 = vld [vmem:[%s5002_s5 + $0x54] sm:$0xf] }
 0x3d0   :  { %2250 = vmatmul.bf16.gmra.mxu2 %v3025_v63  ;;  %v1812_v63 = vadd.f32 %v1811_v27, %v1723_v37  ;;  %v3204_v37 = vld [vmem:[%s5002_s5 + $0x24] sm:$0xf] }
 0x3d1   :  { %v1899_v53 = vadd.f32 %v1898_v5, %v1810_v30 }
 0x3d2   :  { %v1972_v40 = vpop.f32.mrf.mxu1  ;;  %v1901_v25 = vadd.f32 %v1900_v52, %v1812_v63  ;;  %v3058_v63 = vld [vmem:[%s5002_s5 + $0x58] sm:$0xf0] }
 0x3d3   :  { %v1973_v23 = vadd.f32 %v1972_v40, %v4758_v38  ;;  %v5034_v40 = vld [vmem:[#allocation7_spill] sm:$0xff] }
 0x3d4   :  { %v1903_v19 = vpop.f32.mrf.mxu3 }
 0x3d5   :  { %v2019_v24 = vmax.f32 %v1973_v23, 0.0  ;;  %v1904_v33 = vadd.f32 %v1903_v19, %v1815_v57  ;;  %v5035_v23 = vld [vmem:[#allocation15_spill] sm:$0xff]  ;;  %v3045_v57 = vor.u32 %v3206_v47, %v3042_v21 }
 0x3d6   :  { %v1718_v11 = vadd.f32 %v5035_v23, %v5034_v40  ;;  %v4934_v40 = vpop.permute.xlu2 %2139  ;;  %v3212_v23 = vld [vmem:[%s5002_s5 + $0x64] sm:$0xf] }
 0x3da   :  { %v1974_v38 = vpop.f32.mrf.mxu1 }
 0x3db   :  { %v1975_v28 = vadd.f32 %v1974_v38, %v1886_v15  ;;  %v3213_v38 = vld [vmem:[%s5002_s5 + $0x64] sm:$0xf0] }
 0x3dc   :  { %v1905_v55 = vpop.f32.mrf.mxu3  ;;  %v3065_v27 = vor.u32 %v3213_v38, %v3064_v35  ;;  %v3214_v35 = vld [vmem:[%s5002_s5 + $0x74] sm:$0xf]  ;;  %v3074_v38 = vld [vmem:[%s5002_s5 + $0x78] sm:$0xf0] }
 0x3dd   :  { %v2020_v9 = vmax.f32 %v1975_v28, 0.0  ;;  %v1906_v15 = vadd.f32 %v1905_v55, %v1817_v39  ;;  %v5036_v28 = vld [vmem:[#allocation5_spill] sm:$0xff]  ;;  %v3208_v55 = vld [vmem:[%s5002_s5 + $0x44] sm:$0xf]  ;;  %v3061_v39 = vor.u32 %v3210_v51, %v3058_v63 }
 0x3de   :  { %v3053_v6 = vor.u32 %v3208_v55, %v3050_v22 }
 0x3df   :  { %v4837_v7 = vpack.c.bf16 %v2020_v9, %v2019_v24 }
 0x3e0   :  { %2255 = vmatmul.bf16.gmra.mxu2 %v3033_v41  ;;  %v5037_v41 = vld [vmem:[#allocation14_spill] sm:$0xff] }
 0x3e1   :  { %v1716_v24 = vadd.f32 %v5037_v41, %v5036_v28 }
 0x3e2   :  { %v1977_v46 = vpop.f32.mrf.mxu1 }
 0x3e3   :  { %v4840_v8 = vadd.f32 %v1977_v46, %v4785_v45  ;;  %v3048_v45 = vld [vmem:[%s5002_s5 + $0x40] sm:$0xf]  ;;  %v1807_v46 = vadd.f32 %v1806_v54, %v1718_v11  ;;  %v3066_v11 = vld [vmem:[%s5002_s5 + $0x68] sm:$0xf0] }
 0x3e4   :  { %v3049_v59 = vor.u32 %v3209_v18, %v3048_v45  ;;  %v5039_v45 = vld [vmem:[#allocation13_spill] sm:$0xff]  ;;  %v3069_v30 = vor.u32 %v3212_v23, %v3066_v11 }
 0x3e5   :  { %v1713_v18 = vadd.f32 %v5039_v45, %v5038_v34  ;;  %v1896_v52 = vadd.f32 %v1895_v17, %v1807_v46  ;;  %v4952_v46 = vpop.permute.xlu1 %2154 }
 0x3e7   :  { %v1802_v19 = vadd.f32 %v4826_v10, %v1713_v18  ;;  %v2021_v10 = vmax.f32 %v4840_v8, 0.0  ;;  %v3200_v8 = vld [vmem:[%s5002_s5 + $0x4] sm:$0xf] }
 0x3e9   :  { %v1891_v54 = vadd.f32 %v4835_v36, %v1802_v19  ;;  %v3215_v36 = vld [vmem:[%s5002_s5 + $0x74] sm:$0xf0] }
 0x3ea   :  { %v4848_v2 = vpop.f32.mrf.mxu1 }
 0x3eb   :  { %v1980_v62 = vadd.f32 %v4848_v2, %v1891_v54  ;;  %v3018_v2 = vld [vmem:[%s5002_s5 + $0x8] sm:$0xf0] }
 0x3ec   :  { %v3021_v26 = vor.u32 %v3200_v8, %v3018_v2 }
 0x3ed   :  { %v4954_v34 = vpop.permute.xlu1 %2129 }
 0x3f0   :  { %2260 = vmatmul.bf16.gmra.mxu2 %v3041_v0 }
 0x3f2   :  { %v1982_v58 = vpop.f32.mrf.mxu1 }
 0x3fa   :  { %v1984_v16 = vpop.f32.mrf.mxu1 }
 0x400   :  { %2265 = vmatmul.bf16.gmra.mxu2 %v3049_v59  ;;  %v1805_v59 = vadd.f32 %v1804_v42, %v1716_v24  ;;  %v3077_v24 = vor.u32 %v3214_v35, %v3074_v38 }
 0x402   :  { %v1987_v61 = vpop.f32.mrf.mxu1 }
 0x403   :  { %v1988_v43 = vadd.f32 %v1987_v61, %v1899_v53  ;;  %v2022_v61 = vmax.f32 %v1980_v62, 0.0 }
 0x40a   :  { %v1989_v13 = vpop.f32.mrf.mxu1 }
 0x40b   :  { %v1990_v50 = vadd.f32 %v1989_v13, %v1901_v25  ;;  %v2025_v13 = vmax.f32 %v1988_v43, 0.0 }
 0x40d   :  { %v2026_v56 = vmax.f32 %v1990_v50, 0.0 }
 0x40f   :  { %v2043_v14 = vpack.c.bf16 %v2026_v56, %v2025_v13 }
 0x410   :  { %2270 = vmatmul.bf16.gmra.mxu2 %v3057_v3  ;;  %v1894_v3 = vadd.f32 %v1893_v60, %v1805_v59  ;;  %v3072_v60 = vld [vmem:[%s5002_s5 + $0x70] sm:$0xf] }
 0x412   :  { %v1992_v12 = vpop.f32.mrf.mxu1  ;;  %v1983_v5 = vadd.f32 %v1982_v58, %v1894_v3  ;;  %v2041_v58 = vpack.c.bf16 %v2022_v61, %v2021_v10 }
 0x413   :  { %v1993_v4 = vadd.f32 %v1992_v12, %v1904_v33  ;;  %v1985_v12 = vadd.f32 %v1984_v16, %v1896_v52  ;;  %v3073_v16 = vor.u32 %v3215_v36, %v3072_v60  ;;  %v4932_v33 = vpop.permute.xlu0 %2149 }
 0x414   :  { %v2023_v17 = vmax.f32 %v1983_v5, 0.0 }
 0x415   :  { %v2027_v31 = vmax.f32 %v1993_v4, 0.0  ;;  %v2024_v42 = vmax.f32 %v1985_v12, 0.0  ;;  %v4944_v4 = vpop.permute.xlu2 %2134 }
 0x417   :  { %v2042_v1 = vpack.c.bf16 %v2024_v42, %v2023_v17 }
 0x41a   :  { %v1994_v9 = vpop.f32.mrf.mxu1 }
 0x41b   :  { %v1995_v0 = vadd.f32 %v1994_v9, %v1906_v15  ;;  %v4942_v25 = vpop.permute.xlu0 %2144 }
 0x41d   :  { %v2028_v44 = vmax.f32 %v1995_v0, 0.0  ;;  %v2110_v9 = vpop.permute.xlu2 %2109 }
 0x41f   :  { %v2044_v48 = vpack.c.bf16 %v2028_v44, %v2027_v31  ;;  %v4956_v31 = vpop.permute.xlu1 %2124 }
 0x420   :  { %2275 = vmatmul.bf16.gmra.mxu2 %v3065_v27 }
 0x421   :  { %2286 = vmatpush.bf16.msra.mxu3 %v2044_v48 }
 0x423   :  { %v2120_v28 = vpop.permute.xlu0 %2119 }
 0x425   :  { %2287 = vmatpush.bf16.msra.mxu3 %v2043_v14  ;;  %v2105_v0 = vpop.permute.xlu2 %2104 }
 0x427   :  { %v2100_v5 = vpop.permute.xlu1 %2099 }
 0x429   :  { %2288 = vmatpush.bf16.msra.mxu3 %v2042_v1 }
 0x42b   :  { %v2115_v53 = vpop.permute.xlu0 %2114 }
 0x42d   :  { %2289 = vmatpush.bf16.msra.mxu3 %v2041_v58  ;;  %v2080_v59 = vpop.permute.xlu2 %2079 }
 0x42f   :  { %v2095_v61 = vpop.permute.xlu1 %2094 }
 0x430   :  { %2280 = vmatmul.bf16.gmra.mxu2 %v3073_v16 }
 0x431   :  { %2290 = vmatpush.bf16.msra.mxu3 %v4837_v7  ;;  %v3202_v7 = vld [vmem:[%s5002_s5 + $0x14] sm:$0xf] }
 0x433   :  { %v2090_v45 = vpop.permute.xlu0 %2089 }
 0x435   :  { %2291 = vmatpush.bf16.msra.mxu3 %v4820_v32 }
 0x439   :  { %2292 = vmatpush.bf16.msra.mxu3 %v4807_v29  ;;  %v3026_v29 = vld [vmem:[%s5002_s5 + $0x18] sm:$0xf0] }
 0x43a   :  { %v3029_v32 = vor.u32 %v3202_v7, %v3026_v29 }
 0x43b   :  { %v2085_v44 = vpop.permute.xlu0 %2084 }
 0x43d   :  { %2293 = vmatpush.bf16.msra.mxu3 %v4790_v49  ;;  %v3037_v49 = vor.u32 %v3204_v37, %v3034_v20 }
 0x440   :  { %2294 = vmatmul.bf16.vlgmr.msra.gmra.mxu3 %v3021_v26 }
 0x443   :  { %v2246_v15 = vpop.f32.mrf.mxu2 }
 0x444   :  { %v2247_v27 = vadd.f32 %v2246_v15, %v2080_v59 }
 0x44b   :  { %v2248_v41 = vpop.f32.mrf.mxu2 }
 0x44c   :  { %v2249_v3 = vadd.f32 %v2248_v41, %v2085_v44 }
 0x450   :  { %2299 = vmatmul.bf16.gmra.mxu3 %v3029_v32 }
 0x453   :  { %v2251_v50 = vpop.f32.mrf.mxu2 }
 0x454   :  { %v2252_v62 = vadd.f32 %v2251_v50, %v2090_v45 }
 0x45b   :  { %v2253_v18 = vpop.f32.mrf.mxu2 }
 0x45c   :  { %v2254_v1 = vadd.f32 %v2253_v18, %v2095_v61 }
 0x460   :  { %2304 = vmatmul.bf16.gmra.mxu3 %v3037_v49 }
 0x463   :  { %v2256_v19 = vpop.f32.mrf.mxu2 }
 0x464   :  { %v2257_v2 = vadd.f32 %v2256_v19, %v2100_v5 }
 0x46b   :  { %v2258_v42 = vpop.f32.mrf.mxu2 }
 0x46c   :  { %v2259_v32 = vadd.f32 %v2258_v42, %v2105_v0 }
 0x470   :  { %2309 = vmatmul.bf16.gmra.mxu3 %v3045_v57 }
 0x473   :  { %v2261_v36 = vpop.f32.mrf.mxu2 }
 0x474   :  { %v2262_v55 = vadd.f32 %v2261_v36, %v2110_v9 }
 0x47b   :  { %v2263_v29 = vpop.f32.mrf.mxu2 }
 0x47c   :  { %v2264_v51 = vadd.f32 %v2263_v29, %v2115_v53  ;;  %v3218_v29 = vld [vmem:[%s5003_s7 + $0x10] sm:$0xff] }
 0x480   :  { %2314 = vmatmul.bf16.gmra.mxu3 %v3053_v6 }
 0x483   :  { %v2266_v57 = vpop.f32.mrf.mxu2 }
 0x484   :  { %v2267_v35 = vadd.f32 %v2266_v57, %v2120_v28  ;;  %v2408_v57 = vpop.permute.xlu1 %2407 }
 0x48b   :  { %v2268_v63 = vpop.f32.mrf.mxu2 }
 0x490   :  { %2319 = vmatmul.bf16.gmra.mxu3 %v3061_v39 }
 0x4a0   :  { %2324 = vmatmul.bf16.gmra.mxu3 %v3069_v30 }
 0x4b0   :  { %2329 = vmatmul.bf16.gmra.mxu3 %v3077_v24  ;;  %v2271_v24 = vpop.f32.mrf.mxu2 }
 0x4b1   :  { %v2272_v61 = vadd.f32 %v2271_v24, %v4954_v34  ;;  %v3216_v34 = vld [vmem:[%s5003_s7] sm:$0xff] }
 0x4b8   :  { %v2273_v0 = vpop.f32.mrf.mxu2 }
 0x4c0   :  { %v2276_v18 = vpop.f32.mrf.mxu2 }
 0x4c3   :  { %v2295_v52 = vpop.f32.mrf.mxu3 }
 0x4c4   :  { %v2296_v43 = vadd.f32 %v2295_v52, %v2247_v27 }
 0x4c6   :  { %v2335_v48 = vmax.f32 %v2296_v43, 0.0 }
 0x4c8   :  { %v2278_v27 = vpop.f32.mrf.mxu2 }
 0x4cb   :  { %v2297_v12 = vpop.f32.mrf.mxu3 }
 0x4cc   :  { %v2298_v56 = vadd.f32 %v2297_v12, %v2249_v3  ;;  %v2279_v3 = vadd.f32 %v2278_v27, %v4942_v25  ;;  %v2269_v25 = vadd.f32 %v2268_v63, %v4956_v31  ;;  %v3217_v31 = vld [vmem:[%s5003_s7 + $0x8] sm:$0xff]  ;;  %v2403_v63 = vpop.permute.xlu1 %2402 }
 0x4ce   :  { %v2336_v54 = vmax.f32 %v2298_v56, 0.0 }
 0x4d0   :  { %v4958_v13 = vpack.c.bf16 %v2336_v54, %v2335_v48  ;;  %v2281_v43 = vpop.f32.mrf.mxu2  ;;  %v2277_v48 = vadd.f32 %v2276_v18, %v4934_v40 }
 0x4d1   :  { %v2282_v19 = vadd.f32 %v2281_v43, %v4932_v33 }
 0x4d3   :  { %v2300_v14 = vpop.f32.mrf.mxu3 }
 0x4d4   :  { %v2301_v17 = vadd.f32 %v2300_v14, %v2252_v62  ;;  %v2274_v62 = vadd.f32 %v2273_v0, %v4944_v4 }
 0x4d6   :  { %v2337_v58 = vmax.f32 %v2301_v17, 0.0 }
 0x4d8   :  { %v2283_v44 = vpop.f32.mrf.mxu2 }
 0x4d9   :  { %v2284_v28 = vadd.f32 %v2283_v44, %v4952_v46 }
 0x4db   :  { %v2302_v10 = vpop.f32.mrf.mxu3 }
 0x4dc   :  { %v2303_v60 = vadd.f32 %v2302_v10, %v2254_v1 }
 0x4de   :  { %v2338_v16 = vmax.f32 %v2303_v60, 0.0 }
 0x4e0   :  { %v4960_v8 = vpack.c.bf16 %v2338_v16, %v2337_v58 }
 0x4e3   :  { %v2305_v26 = vpop.f32.mrf.mxu3 }
 0x4e4   :  { %v2306_v7 = vadd.f32 %v2305_v26, %v2257_v2 }
 0x4e6   :  { %v2339_v49 = vmax.f32 %v2306_v7, 0.0 }
 0x4eb   :  { %v2307_v37 = vpop.f32.mrf.mxu3 }
 0x4ec   :  { %v2308_v20 = vadd.f32 %v2307_v37, %v2259_v32 }
 0x4ee   :  { %v2340_v47 = vmax.f32 %v2308_v20, 0.0 }
 0x4f0   :  { %v2353_v21 = vpack.c.bf16 %v2340_v47, %v2339_v49 }
 0x4f3   :  { %v2310_v22 = vpop.f32.mrf.mxu3 }
 0x4f4   :  { %v2311_v6 = vadd.f32 %v2310_v22, %v2262_v55  ;;  %v2398_v22 = vpop.permute.xlu0 %2397 }
 0x4f6   :  { %v2341_v11 = vmax.f32 %v2311_v6, 0.0 }
 0x4fb   :  { %v2312_v39 = vpop.f32.mrf.mxu3 }
 0x4fc   :  { %v2313_v23 = vadd.f32 %v2312_v39, %v2264_v51 }
 0x4fe   :  { %v2342_v30 = vmax.f32 %v2313_v23, 0.0 }
 0x500   :  { %v2354_v15 = vpack.c.bf16 %v2342_v30, %v2341_v11 }
 0x503   :  { %v2315_v38 = vpop.f32.mrf.mxu3 }
 0x504   :  { %v2316_v41 = vadd.f32 %v2315_v38, %v2267_v35  ;;  %v2393_v38 = vpop.permute.xlu0 %2392 }
 0x506   :  { %v2343_v26 = vmax.f32 %v2316_v41, 0.0 }
 0x50b   :  { %v2317_v50 = vpop.f32.mrf.mxu3 }
 0x50c   :  { %v2318_v36 = vadd.f32 %v2317_v50, %v2269_v25 }
 0x50e   :  { %v2344_v2 = vmax.f32 %v2318_v36, 0.0 }
 0x510   :  { %v2355_v7 = vpack.c.bf16 %v2344_v2, %v2343_v26 }
 0x513   :  { %v2320_v45 = vpop.f32.mrf.mxu3 }
 0x514   :  { %v2321_v60 = vadd.f32 %v2320_v45, %v2272_v61 }
 0x516   :  { %v2345_v16 = vmax.f32 %v2321_v60, 0.0 }
 0x51b   :  { %v2322_v59 = vpop.f32.mrf.mxu3 }
 0x51c   :  { %v2323_v1 = vadd.f32 %v2322_v59, %v2274_v62 }
 0x51e   :  { %v2346_v58 = vmax.f32 %v2323_v1, 0.0 }
 0x520   :  { %v2356_v4 = vpack.c.bf16 %v2346_v58, %v2345_v16 }
 0x523   :  { %v2325_v9 = vpop.f32.mrf.mxu3 }
 0x524   :  { %v2326_v42 = vadd.f32 %v2325_v9, %v2277_v48 }
 0x526   :  { %v2347_v46 = vmax.f32 %v2326_v42, 0.0 }
 0x52b   :  { %v2327_v52 = vpop.f32.mrf.mxu3 }
 0x52c   :  { %v2328_v54 = vadd.f32 %v2327_v52, %v2279_v3  ;;  %v2378_v52 = vpop.permute.xlu1 %2377 }
 0x52e   :  { %v2348_v10 = vmax.f32 %v2328_v54, 0.0  ;;  %v2491_v54 = vpop.permute.xlu0 %2490 }
 0x530   :  { %v2357_v40 = vpack.c.bf16 %v2348_v10, %v2347_v46 }
 0x533   :  { %v2330_v53 = vpop.f32.mrf.mxu3 }
 0x534   :  { %v2331_v12 = vadd.f32 %v2330_v53, %v2282_v19 }
 0x536   :  { %v2349_v14 = vmax.f32 %v2331_v12, 0.0  ;;  %v3220_v12 = vld [vmem:[%s5004_s9] sm:$0xff] }
 0x53b   :  { %v2332_v56 = vpop.f32.mrf.mxu3 }
 0x53c   :  { %v2333_v5 = vadd.f32 %v2332_v56, %v2284_v28  ;;  %v3221_v56 = vld [vmem:[%s5004_s9 + $0x8] sm:$0xff] }
 0x53e   :  { %v2350_v17 = vmax.f32 %v2333_v5, 0.0  ;;  %v2496_v5 = vpop.permute.xlu1 %2495 }
 0x540   :  { %v2358_v33 = vpack.c.bf16 %v2350_v17, %v2349_v14  ;;  %v2506_v14 = vpop.permute.xlu0 %2505 }
 0x542   :  { %2439 = vmatpush.bf16.msra.mxu2 %v2358_v33 }
 0x546   :  { %2440 = vmatpush.bf16.msra.mxu2 %v2357_v40  ;;  %v2555_v33 = vpop.permute.xlu1 %2554 }
 0x548   :  { %v2565_v40 = vpop.permute.xlu0 %2564 }
 0x54a   :  { %2441 = vmatpush.bf16.msra.mxu2 %v2356_v4 }
 0x54e   :  { %2442 = vmatpush.bf16.msra.mxu2 %v2355_v7 }
 0x552   :  { %2443 = vmatpush.bf16.msra.mxu2 %v2354_v15 }
 0x556   :  { %2444 = vmatpush.bf16.msra.mxu2 %v2353_v21  ;;  %v2413_v21 = vpop.permute.xlu2 %2412 }
 0x55a   :  { %2445 = vmatpush.bf16.msra.mxu2 %v4960_v8  ;;  %v3219_v8 = vld [vmem:[%s5003_s7 + $0x18] sm:$0xff] }
 0x55e   :  { %2446 = vmatpush.bf16.msra.mxu2 %v4958_v13  ;;  %v2388_v6 = vpop.permute.xlu2 %2387 }
 0x561   :  { %2447 = vmatmul.bf16.vlgmr.msra.gmra.mxu2 %v3216_v34 }
 0x566   :  { %v2383_v18 = vpop.permute.xlu2 %2382 }
 0x56e   :  { %v2501_v42 = vpop.permute.xlu2 %2500 }
 0x571   :  { %2452 = vmatmul.bf16.gmra.mxu2 %v3217_v31  ;;  %v2570_v31 = vpop.permute.xlu1 %2569 }
 0x576   :  { %v2560_v36 = vpop.permute.xlu2 %2559 }
 0x581   :  { %2457 = vmatmul.bf16.gmra.mxu2 %v3218_v29 }
 0x591   :  { %2462 = vmatmul.bf16.gmra.mxu2 %v3219_v8 }
 0x5e4   :  { %v2448_v32 = vpop.f32.mrf.mxu2 }
 0x5e5   :  { %v2449_v43 = vadd.f32 %v2448_v32, %v2378_v52 }
 0x5e7   :  { %v2468_v3 = vmax.f32 %v2449_v43, 0.0 }
 0x5ec   :  { %v2450_v37 = vpop.f32.mrf.mxu2 }
 0x5ed   :  { %v2451_v59 = vadd.f32 %v2450_v37, %v2383_v18 }
 0x5ef   :  { %v2469_v44 = vmax.f32 %v2451_v59, 0.0 }
 0x5f1   :  { %v2476_v28 = vpack.c.bf16 %v2469_v44, %v2468_v3 }
 0x5f4   :  { %v2453_v20 = vpop.f32.mrf.mxu2 }
 0x5f5   :  { %v2454_v0 = vadd.f32 %v2453_v20, %v2388_v6 }
 0x5f7   :  { %v2470_v53 = vmax.f32 %v2454_v0, 0.0 }
 0x5fc   :  { %v2455_v13 = vpop.f32.mrf.mxu2 }
 0x5fd   :  { %v2456_v41 = vadd.f32 %v2455_v13, %v2393_v38 }
 0x5ff   :  { %v2471_v27 = vmax.f32 %v2456_v41, 0.0 }
 0x601   :  { %v2477_v19 = vpack.c.bf16 %v2471_v27, %v2470_v53 }
 0x604   :  { %v2458_v49 = vpop.f32.mrf.mxu2 }
 0x605   :  { %v2459_v30 = vadd.f32 %v2458_v49, %v2398_v22 }
 0x607   :  { %v2472_v45 = vmax.f32 %v2459_v30, 0.0 }
 0x60c   :  { %v2460_v47 = vpop.f32.mrf.mxu2 }
 0x60d   :  { %v2461_v23 = vadd.f32 %v2460_v47, %v2403_v63  ;;  %v2589_v47 = vpop.permute.xlu2 %2588 }
 0x60f   :  { %v2473_v24 = vmax.f32 %v2461_v23, 0.0 }
 0x611   :  { %v2478_v9 = vpack.c.bf16 %v2473_v24, %v2472_v45 }
 0x614   :  { %v2463_v55 = vpop.f32.mrf.mxu2 }
 0x615   :  { %v2464_v51 = vadd.f32 %v2463_v55, %v2408_v57  ;;  %v2591_v57 = vperm.slane %v2589_v47, 0 }
 0x617   :  { %v2474_v15 = vmax.f32 %v2464_v51, 0.0 }
 0x61c   :  { %v2465_v39 = vpop.f32.mrf.mxu2 }
 0x61d   :  { %v2466_v11 = vadd.f32 %v2465_v39, %v2413_v21 }
 0x61f   :  { %v2475_v35 = vmax.f32 %v2466_v11, 0.0 }
 0x621   :  { %v2479_v50 = vpack.c.bf16 %v2475_v35, %v2474_v15 }
 0x623   :  { %2529 = vmatpush.bf16.msrb.mxu3 %v2479_v50 }
 0x627   :  { %2530 = vmatpush.bf16.msrb.mxu3 %v2478_v9 }
 0x62b   :  { %2531 = vmatpush.bf16.msrb.mxu3 %v2477_v19 }
 0x62f   :  { %2532 = vmatpush.bf16.msrb.mxu3 %v2476_v28 }
 0x632   :  { %3102 = vmatmul.msk.bf16.vlgmr.msrb.gmra.mxu3 %vm2518_vm1, %v3220_v12 }
 0x642   :  { %3103 = vmatmul.msk.bf16.gmra.mxu3 %vm2518_vm1, %v3221_v56 }
 0x6b5   :  { %v2534_v48 = vpop.f32.mrf.mxu3 }
 0x6b6   :  { %v2535_v1 = vadd.f32 %v2534_v48, %v2491_v54 }
 0x6b8   :  { %v2544_v60 = vmax.f32 %v2535_v1, 0.0 }
 0x6ba   :  { %v2572_v2 = vmul.f32 %v2555_v33, %v2544_v60 }
 0x6bd   :  { %v2536_v62 = vpop.f32.mrf.mxu3 }
 0x6be   :  { %v2537_v17 = vadd.f32 %v2536_v62, %v2496_v5 }
 0x6c0   :  { %v2545_v25 = vmax.f32 %v2537_v17, 0.0 }
 0x6c2   :  { %v2573_v58 = vmul.f32 %v2560_v36, %v2545_v25 }
 0x6c4   :  { %v2576_v7 = vadd.f32 %v2573_v58, %v2572_v2 }
 0x6c5   :  { %v2539_v61 = vpop.f32.mrf.mxu3 }
 0x6c6   :  { %v2540_v10 = vadd.f32 %v2539_v61, %v2501_v42 }
 0x6c8   :  { %v2546_v46 = vmax.f32 %v2540_v10, 0.0 }
 0x6ca   :  { %v2574_v4 = vmul.f32 %v2565_v40, %v2546_v46 }
 0x6cc   :  { %v2577_v29 = vadd.f32 %v2576_v7, %v2574_v4 }
 0x6cd   :  { %v2541_v16 = vpop.f32.mrf.mxu3 }
 0x6ce   :  { %v2542_v26 = vadd.f32 %v2541_v16, %v2506_v14 }
 0x6d0   :  { %v2547_v34 = vmax.f32 %v2542_v26, 0.0 }
 0x6d2   :  { %v2575_v8 = vmul.f32 %v2570_v31, %v2547_v34 }
 0x6d4   :  { %v2578_v32 = vadd.f32 %v2577_v29, %v2575_v8 }
 0x6d6   :  { %v2579_v37 = vrot.slane %v2578_v32, 4 }
 0x6d8   :  { %v2580_v20 = vadd.f32 %v2579_v37, %v2578_v32 }
 0x6da   :  { %v2581_v13 = vrot.slane %v2580_v20, 2 }
 0x6dc   :  { %v2582_v49 = vadd.f32 %v2581_v13, %v2580_v20 }
 0x6de   :  { %v2583_v21 = vrot.slane %v2582_v49, 1 }
 0x6e0   :  { %v2584_v55 = vadd.f32 %v2583_v21, %v2582_v49 }
 0x6e2   :  { %v2592_v22 = vadd.f32 %v2591_v57, %v2584_v55 }
 0x6e4   :  { %2593 = vst [vmem:[%s5005_s13] sm:$0x1] %v2592_v22 }

</bundles_post_ra>
